<compile_context>
chip_gen: v7x
topology: tpu7x:2x2x1
jax: 0.10.0
libtpu: 0.0.40
codegen_flags: <defaults>
</compile_context>

<pallas_src>
import jax
import jax.numpy as jnp
from jax.experimental import pallas as pl
from jax.experimental.pallas import tpu as pltpu

H, W = 7, 7
HW = H * W
C0, C1, C2 = 672, 128, 32   # in-channels, mid-channels, out-channels
EPS = 1e-5
KH, KW = 3, 3


def _fused_kernel(x_ref, s1_ref, b1_ref, w1_ref, s2_ref, b2_ref, w2_ref, o_ref):
    # x arrives channel-major (C0, HW); transpose once in-kernel (XLU) so the
    # BN affine params stay lane-dense (1, C) and conv1 is a plain NN matmul.
    xt = jnp.transpose(x_ref[...])                                        # (HW, C0) f32

    # ---- BN1 + ReLU (f32 VPU; per-channel affine, channels in lanes) ----
    y1 = jnp.maximum(xt * s1_ref[...] + b1_ref[...], 0.0)                 # (HW, C0)

    # ---- Conv 1x1 (672 -> 128): one MXU matmul, f32 x f32 -> f32 ----
    w1 = w1_ref[...].astype(jnp.float32)                                  # (C0, C1)
    y2 = jnp.dot(y1, w1, preferred_element_type=jnp.float32)              # (HW, C1)

    # ---- BN2 + ReLU (f32) ----
    y3 = jnp.maximum(y2 * s2_ref[...] + b2_ref[...], 0.0)                 # (HW, C1)

    # ---- Conv 3x3, pad=1 (128 -> 32) as ONE im2col matmul ----
    # Flattened row r = h*W + w ; tap (dh, dw) reads row r + W*(dh-1) + (dw-1).
    # 8 zero rows on either side absorb all h-out-of-range reads.  The
    # w-out-of-range (row-wrap) reads are handled by two PRE-masked copies of
    # y3: dw==0 taps can only wrap onto input col W-1 and dw==2 taps only onto
    # input col 0, so zeroing those columns once up front is equivalent to
    # masking every tap (valid reads never touch the zeroed columns).
    col = jax.lax.broadcasted_iota(jnp.int32, (HW, 1), 0) % W             # (HW, 1) spatial col
    y3_l = jnp.where(col != W - 1, y3, 0.0)                               # for dw == 0 taps
    y3_r = jnp.where(col != 0, y3, 0.0)                                   # for dw == 2 taps

    pad8 = jnp.zeros((8, C1), jnp.float32)
    srcs = [jnp.concatenate([pad8, y, pad8], axis=0)                      # (HW + 16, C1)
            for y in (y3_l, y3, y3_r)]

    taps = []
    for dh in range(KH):
        for dw in range(KW):
            off = (dh - 1) * W + (dw - 1)                                 # -8 .. 8
            taps.append(srcs[dw][8 + off:8 + off + HW, :])                # (HW, C1) static slice
    im2col = jnp.concatenate(taps, axis=1)                                # (HW, 9*C1)

    # (C2, 9*C1) x (HW, 9*C1)^T -> (C2, HW): output channel-major, so the
    # wrapper only needs a free reshape (no transpose).
    w2 = w2_ref[...].astype(jnp.float32)                                  # (C2, 9*C1)
    o_ref[...] = jax.lax.dot_general(
        w2, im2col, dimension_numbers=(((1,), (1,)), ((), ())),
        preferred_element_type=jnp.float32)                               # (C2, HW)


@jax.jit
def fused_forward(x_nchw, s1, b1, w1_bf16, s2, b2, w2_bf16):
    """x_nchw: (1, C0, H, W) f32.  w1_bf16: (C0, C1) bf16.  w2_bf16: (C2, KH*KW*C1) bf16.

    Returns (1, C2, H, W) f32.
    """
    x2d = x_nchw.reshape(C0, HW)                       # free reshape, no transpose
    out2d = pl.pallas_call(
        _fused_kernel,
        out_shape=jax.ShapeDtypeStruct((C2, HW), jnp.float32),
        in_specs=[pl.BlockSpec(memory_space=pltpu.MemorySpace.VMEM)] * 7,
        out_specs=pl.BlockSpec(memory_space=pltpu.MemorySpace.VMEM),
        cost_estimate=pl.CostEstimate(
            flops=12_100_000, transcendentals=0, bytes_accessed=620_000),
    )(x2d,
      s1.reshape(1, C0), b1.reshape(1, C0), w1_bf16,
      s2.reshape(1, C1), b2.reshape(1, C1), w2_bf16)
    return out2d.reshape(1, C2, H, W)                  # channel-major -> NCHW, free


def reference_forward(x, gamma1, beta1, mean1, var1, w1_oihw,
                      gamma2, beta2, mean2, var2, w2_oihw):
    hi = jax.lax.Precision.HIGHEST
    y = (x - mean1[None, :, None, None]) * (
        gamma1 / jnp.sqrt(var1 + EPS))[None, :, None, None] + beta1[None, :, None, None]
    y = jnp.maximum(y, 0.0)
    y = jax.lax.conv_general_dilated(
        y, w1_oihw, (1, 1), 'VALID',
        dimension_numbers=('NCHW', 'OIHW', 'NCHW'), precision=hi)
    y = (y - mean2[None, :, None, None]) * (
        gamma2 / jnp.sqrt(var2 + EPS))[None, :, None, None] + beta2[None, :, None, None]
    y = jnp.maximum(y, 0.0)
    y = jax.lax.conv_general_dilated(
        y, w2_oihw, (1, 1), ((1, 1), (1, 1)),
        dimension_numbers=('NCHW', 'OIHW', 'NCHW'), precision=hi)
    return y


if __name__ == "__main__":
    key = jax.random.PRNGKey(0)
    ks = jax.random.split(key, 12)

    # Input (same shape as the PyTorch reference: [1, 672, 7, 7])
    x = jax.random.normal(ks[0], (1, C0, H, W), jnp.float32)

    # BN1 params (672)
    gamma1 = jax.random.uniform(ks[1], (C0,), jnp.float32, 0.5, 1.5)
    beta1 = 0.1 * jax.random.normal(ks[2], (C0,), jnp.float32)
    mean1 = 0.1 * jax.random.normal(ks[3], (C0,), jnp.float32)
    var1 = jax.random.uniform(ks[4], (C0,), jnp.float32, 0.5, 1.5)

    # Conv1 weight: torch shape (128, 672, 1, 1) -> [Cin, Cout]
    w1_oihw = jax.random.normal(ks[5], (C1, C0, 1, 1), jnp.float32) * (1.0 / jnp.sqrt(C0))
    w1_io = jnp.transpose(w1_oihw[:, :, 0, 0], (1, 0))      # (C0, C1)

    # BN2 params (128)
    gamma2 = jax.random.uniform(ks[6], (C1,), jnp.float32, 0.5, 1.5)
    beta2 = 0.1 * jax.random.normal(ks[7], (C1,), jnp.float32)
    mean2 = 0.1 * jax.random.normal(ks[8], (C1,), jnp.float32)
    var2 = jax.random.uniform(ks[9], (C1,), jnp.float32, 0.5, 1.5)

    # Conv2 weight: torch shape (32, 128, 3, 3) -> lane-dense packed (C2, 9*C1)
    # with column index = (kh*KW + kw)*C1 + c1, matching the kernel's tap order.
    w2_oihw = jax.random.normal(ks[10], (C2, C1, KH, KW), jnp.float32) * (1.0 / jnp.sqrt(C1 * KH * KW))
    w2_packed = jnp.transpose(w2_oihw, (0, 2, 3, 1)).reshape(C2, KH * KW * C1)   # (32, 1152)

    # Fold BN running stats into per-channel scale/bias (inference semantics, f32)
    s1 = gamma1 / jnp.sqrt(var1 + EPS)
    b1 = beta1 - mean1 * s1
    s2 = gamma2 / jnp.sqrt(var2 + EPS)
    b2 = beta2 - mean2 * s2

    # Weights stored in bf16 (halves weight DMA); upcast to f32 inside the kernel.
    w1_bf16 = w1_io.astype(jnp.bfloat16)
    w2_bf16 = w2_packed.astype(jnp.bfloat16)

    out = fused_forward(x, s1, b1, w1_bf16, s2, b2, w2_bf16)
    out = jax.block_until_ready(out)

    ref = reference_forward(x, gamma1, beta1, mean1, var1, w1_oihw,
                            gamma2, beta2, mean2, var2, w2_oihw)
    ref = jax.block_until_ready(ref)

    assert out.shape == (1, C2, H, W), out.shape
    # Tolerance accounts for the bf16 round-trip of the weights (f32 matmuls,
    # f32 accumulation) over two chained reductions (K=672 and K=1152) vs an
    # f32 HIGHEST reference.
    assert jnp.allclose(out, ref, atol=3e-2, rtol=3e-2), float(jnp.max(jnp.abs(out - ref)))
    print("KERNEL_OK")
</pallas_src>

<mosaic_0001>
module attributes {stable_mosaic.version = 11 : i64} {
  func.func @_fused_kernel(%arg0: memref<672x49xf32, #tpu.memory_space<vmem>>, %arg1: memref<1x672xf32, #tpu.memory_space<vmem>>, %arg2: memref<1x672xf32, #tpu.memory_space<vmem>>, %arg3: memref<672x128xbf16, #tpu.memory_space<vmem>>, %arg4: memref<1x128xf32, #tpu.memory_space<vmem>>, %arg5: memref<1x128xf32, #tpu.memory_space<vmem>>, %arg6: memref<32x1152xbf16, #tpu.memory_space<vmem>>, %arg7: memref<32x49xf32, #tpu.memory_space<vmem>>) attributes {dimension_semantics = [], scalar_prefetch = 0 : i64, scratch_operands = 0 : i64, tpu.core_type = #tpu.core_type<tc>} {
    %c0 = arith.constant 0 : index
    %c0_0 = arith.constant 0 : index
    %0 = vector.load %arg0[%c0, %c0_0] : memref<672x49xf32, #tpu.memory_space<vmem>>, vector<672x49xf32>
    %1 = tpu.transpose %0, [1, 0] : vector<672x49xf32> -> vector<49x672xf32>
    %c0_1 = arith.constant 0 : index
    %c0_2 = arith.constant 0 : index
    %2 = vector.load %arg1[%c0_1, %c0_2] : memref<1x672xf32, #tpu.memory_space<vmem>>, vector<1x672xf32>
    %3 = vector.broadcast %2 : vector<1x672xf32> to vector<49x672xf32>
    %4 = arith.mulf %1, %3 : vector<49x672xf32>
    %c0_3 = arith.constant 0 : index
    %c0_4 = arith.constant 0 : index
    %5 = vector.load %arg2[%c0_3, %c0_4] : memref<1x672xf32, #tpu.memory_space<vmem>>, vector<1x672xf32>
    %6 = vector.broadcast %5 : vector<1x672xf32> to vector<49x672xf32>
    %7 = arith.addf %4, %6 : vector<49x672xf32>
    %cst = arith.constant 0.000000e+00 : f32
    %8 = vector.broadcast %cst : f32 to vector<49x672xf32>
    %9 = arith.maximumf %7, %8 : vector<49x672xf32>
    %c0_5 = arith.constant 0 : index
    %c0_6 = arith.constant 0 : index
    %10 = vector.load %arg3[%c0_5, %c0_6] : memref<672x128xbf16, #tpu.memory_space<vmem>>, vector<672x128xbf16>
    %11 = arith.extf %10 : vector<672x128xbf16> to vector<672x128xf32>
    %cst_7 = arith.constant dense<0.000000e+00> : vector<49x128xf32>
    %12 = tpu.matmul %9, %11, %cst_7 {dimension_numbers = #tpu.dot_dimension_numbers<[1], [0], [0], [1], [0, 0, 1, 1], [], []>} : vector<49x672xf32>, vector<672x128xf32>, vector<49x128xf32> -> vector<49x128xf32>
    %c0_8 = arith.constant 0 : index
    %c0_9 = arith.constant 0 : index
    %13 = vector.load %arg4[%c0_8, %c0_9] : memref<1x128xf32, #tpu.memory_space<vmem>>, vector<1x128xf32>
    %14 = vector.broadcast %13 : vector<1x128xf32> to vector<49x128xf32>
    %15 = arith.mulf %12, %14 : vector<49x128xf32>
    %c0_10 = arith.constant 0 : index
    %c0_11 = arith.constant 0 : index
    %16 = vector.load %arg5[%c0_10, %c0_11] : memref<1x128xf32, #tpu.memory_space<vmem>>, vector<1x128xf32>
    %17 = vector.broadcast %16 : vector<1x128xf32> to vector<49x128xf32>
    %18 = arith.addf %15, %17 : vector<49x128xf32>
    %cst_12 = arith.constant 0.000000e+00 : f32
    %19 = vector.broadcast %cst_12 : f32 to vector<49x128xf32>
    %20 = arith.maximumf %18, %19 : vector<49x128xf32>
    %21 = tpu.iota {dimensions = array<i32: 0>} : vector<49x1xi32>
    %c7_i32 = arith.constant 7 : i32
    %c0_i32 = arith.constant 0 : i32
    %22 = arith.cmpi eq, %c7_i32, %c0_i32 : i32
    %c1_i32 = arith.constant 1 : i32
    %23 = arith.select %22, %c1_i32, %c7_i32 : i32
    %24 = vector.broadcast %23 : i32 to vector<49x1xi32>
    %25 = arith.remsi %21, %24 : vector<49x1xi32>
    %c0_i32_13 = arith.constant 0 : i32
    %26 = vector.broadcast %c0_i32_13 : i32 to vector<49x1xi32>
    %27 = arith.cmpi ne, %25, %26 : vector<49x1xi32>
    %c0_i32_14 = arith.constant 0 : i32
    %28 = vector.broadcast %c0_i32_14 : i32 to vector<49x1xi32>
    %29 = arith.cmpi slt, %25, %28 : vector<49x1xi32>
    %c0_i32_15 = arith.constant 0 : i32
    %30 = arith.cmpi slt, %23, %c0_i32_15 : i32
    %31 = vector.broadcast %30 : i1 to vector<49x1xi1>
    %32 = vector.broadcast %31 : vector<49x1xi1> to vector<49x1xi1>
    %33 = arith.xori %29, %32 : vector<49x1xi1>
    %34 = arith.andi %33, %27 : vector<49x1xi1>
    %35 = vector.broadcast %23 : i32 to vector<49x1xi32>
    %36 = arith.addi %25, %35 : vector<49x1xi32>
    %37 = arith.select %34, %36, %25 : vector<49x1xi1>, vector<49x1xi32>
    %c6_i32 = arith.constant 6 : i32
    %38 = vector.broadcast %c6_i32 : i32 to vector<49x1xi32>
    %39 = arith.cmpi ne, %37, %38 : vector<49x1xi32>
    %cst_16 = arith.constant 0.000000e+00 : f32
    %40 = vector.shape_cast %39 : vector<49x1xi1> to vector<49x1xi1>
    %41 = vector.broadcast %40 : vector<49x1xi1> to vector<49x128xi1>
    %42 = vector.broadcast %cst_16 : f32 to vector<49x128xf32>
    %43 = arith.select %41, %20, %42 : vector<49x128xi1>, vector<49x128xf32>
    %c0_i32_17 = arith.constant 0 : i32
    %44 = vector.broadcast %c0_i32_17 : i32 to vector<49x1xi32>
    %45 = arith.cmpi ne, %37, %44 : vector<49x1xi32>
    %cst_18 = arith.constant 0.000000e+00 : f32
    %46 = vector.shape_cast %45 : vector<49x1xi1> to vector<49x1xi1>
    %47 = vector.broadcast %46 : vector<49x1xi1> to vector<49x128xi1>
    %48 = vector.broadcast %cst_18 : f32 to vector<49x128xf32>
    %49 = arith.select %47, %20, %48 : vector<49x128xi1>, vector<49x128xf32>
    %cst_19 = arith.constant 0.000000e+00 : f32
    %50 = vector.broadcast %cst_19 : f32 to vector<8x128xf32>
    %51 = tpu.concatenate %50, %43, %50 in 0 : vector<8x128xf32>, vector<49x128xf32>, vector<8x128xf32> -> vector<65x128xf32>
    %52 = tpu.concatenate %50, %20, %50 in 0 : vector<8x128xf32>, vector<49x128xf32>, vector<8x128xf32> -> vector<65x128xf32>
    %53 = tpu.concatenate %50, %49, %50 in 0 : vector<8x128xf32>, vector<49x128xf32>, vector<8x128xf32> -> vector<65x128xf32>
    %54 = vector.extract_strided_slice %51 {offsets = [0, 0], sizes = [49, 128], strides = [1, 1]} : vector<65x128xf32> to vector<49x128xf32>
    %55 = vector.extract_strided_slice %52 {offsets = [1, 0], sizes = [49, 128], strides = [1, 1]} : vector<65x128xf32> to vector<49x128xf32>
    %56 = vector.extract_strided_slice %53 {offsets = [2, 0], sizes = [49, 128], strides = [1, 1]} : vector<65x128xf32> to vector<49x128xf32>
    %57 = vector.extract_strided_slice %51 {offsets = [7, 0], sizes = [49, 128], strides = [1, 1]} : vector<65x128xf32> to vector<49x128xf32>
    %58 = vector.extract_strided_slice %52 {offsets = [8, 0], sizes = [49, 128], strides = [1, 1]} : vector<65x128xf32> to vector<49x128xf32>
    %59 = vector.extract_strided_slice %53 {offsets = [9, 0], sizes = [49, 128], strides = [1, 1]} : vector<65x128xf32> to vector<49x128xf32>
    %60 = vector.extract_strided_slice %51 {offsets = [14, 0], sizes = [49, 128], strides = [1, 1]} : vector<65x128xf32> to vector<49x128xf32>
    %61 = vector.extract_strided_slice %52 {offsets = [15, 0], sizes = [49, 128], strides = [1, 1]} : vector<65x128xf32> to vector<49x128xf32>
    %62 = vector.extract_strided_slice %53 {offsets = [16, 0], sizes = [49, 128], strides = [1, 1]} : vector<65x128xf32> to vector<49x128xf32>
    %63 = tpu.concatenate %54, %55, %56, %57, %58, %59, %60, %61, %62 in 1 : vector<49x128xf32>, vector<49x128xf32>, vector<49x128xf32>, vector<49x128xf32>, vector<49x128xf32>, vector<49x128xf32>, vector<49x128xf32>, vector<49x128xf32>, vector<49x128xf32> -> vector<49x1152xf32>
    %c0_20 = arith.constant 0 : index
    %c0_21 = arith.constant 0 : index
    %64 = vector.load %arg6[%c0_20, %c0_21] : memref<32x1152xbf16, #tpu.memory_space<vmem>>, vector<32x1152xbf16>
    %65 = arith.extf %64 : vector<32x1152xbf16> to vector<32x1152xf32>
    %cst_22 = arith.constant dense<0.000000e+00> : vector<32x49xf32>
    %66 = tpu.matmul %65, %63, %cst_22 {dimension_numbers = #tpu.dot_dimension_numbers<[1], [1], [0], [0], [0, 0, 1, 0], [], []>} : vector<32x1152xf32>, vector<49x1152xf32>, vector<32x49xf32> -> vector<32x49xf32>
    %c0_23 = arith.constant 0 : index
    %c0_24 = arith.constant 0 : index
    %67 = vector.load %arg7[%c0_23, %c0_24] : memref<32x49xf32, #tpu.memory_space<vmem>>, vector<32x49xf32>
    tpu.vector_store %arg7[%c0_23, %c0_24], %66 {strides = array<i32>} : memref<32x49xf32, #tpu.memory_space<vmem>>, vector<32x49xf32>,
    return
  }
}

</mosaic_0001>

<bundles_post_ra>
// kernel: fused_forward.1
= control target key start
LH: loop header
LB: loop body
LE: loop exit
PB: predicated region body
PF: predicated region fallthrough
CT: control target
= control target key end

     0   :  { %vm660_vm0 = vcmask 261120   ;;  %s3600_s0 = inlined_call_operand.vmem [shape: f32[672,49], index: 0, kind: input, shape index: {}]   ;;  %s3601_s3 = inlined_call_operand.vmem [shape: bf16[672,128], index: 3, kind: input, shape index: {}]   ;;  %s3602_s1 = inlined_call_operand.vmem [shape: f32[1,672], index: 1, kind: input, shape index: {}]   ;;  %s3603_s2 = inlined_call_operand.vmem [shape: f32[1,672], index: 2, kind: input, shape index: {}]   ;;  %s3604_s6 = inlined_call_operand.vmem [shape: bf16[32,1152], index: 6, kind: input, shape index: {}]   ;;  %s3605_s4 = inlined_call_operand.vmem [shape: f32[1,128], index: 4, kind: input, shape index: {}]   ;;  %s3606_s5 = inlined_call_operand.vmem [shape: f32[1,128], index: 5, kind: input, shape index: {}]   ;;  %s3607_s7 = inlined_call_operand.vmem [shape: f32[32,49], index: 7, kind: output, shape index: {}]  }
   0x1   :  { %v42_v0 = vld [vmem:[%s3600_s0 + $0x80] sm:$0xff]  ;;  %v43_v2 = vld [vmem:[%s3600_s0 + $0x88] sm:$0xff]  ;;  %v44_v4 = vld [vmem:[%s3600_s0 + $0x90] sm:$0xff] }
   0x2   :  { %v26_v1 = vld [vmem:[%s3600_s0] sm:$0xff]  ;;  %142 = vxpose.xlu0.b32.start [1/16] (narrow) %v42_v0, 56  ;;  %v27_v3 = vld [vmem:[%s3600_s0 + $0x8] sm:$0xff]  ;;  %v28_v5 = vld [vmem:[%s3600_s0 + $0x10] sm:$0xff] }
   0x3   :  { %110 = vxpose.xlu1.b32.start [1/16] (narrow) %v26_v1, 56  ;;  %v45_v6 = vld [vmem:[%s3600_s0 + $0x98] sm:$0xff]  ;;  %v46_v8 = vld [vmem:[%s3600_s0 + $0xa0] sm:$0xff]  ;;  %v47_v10 = vld [vmem:[%s3600_s0 + $0xa8] sm:$0xff] }
   0x4   :  { %v29_v7 = vld [vmem:[%s3600_s0 + $0x18] sm:$0xff]  ;;  %v30_v9 = vld [vmem:[%s3600_s0 + $0x20] sm:$0xff]  ;;  %v31_v11 = vld [vmem:[%s3600_s0 + $0x28] sm:$0xff] }
   0x5   :  { %v48_v12 = vld [vmem:[%s3600_s0 + $0xb0] sm:$0xff]  ;;  %v49_v14 = vld [vmem:[%s3600_s0 + $0xb8] sm:$0xff]  ;;  %v50_v16 = vld [vmem:[%s3600_s0 + $0xc0] sm:$0xff] }
   0x6   :  { %143 = vxpose.xlu0.b32.cont [2/16] (narrow) %v43_v2, 56  ;;  %v32_v13 = vld [vmem:[%s3600_s0 + $0x30] sm:$0xff]  ;;  %v33_v15 = vld [vmem:[%s3600_s0 + $0x38] sm:$0xff]  ;;  %v34_v17 = vld [vmem:[%s3600_s0 + $0x40] sm:$0xff] }
   0x7   :  { %111 = vxpose.xlu1.b32.cont [2/16] (narrow) %v27_v3, 56  ;;  %v51_v18 = vld [vmem:[%s3600_s0 + $0xc8] sm:$0xff]  ;;  %v52_v20 = vld [vmem:[%s3600_s0 + $0xd0] sm:$0xff]  ;;  %v53_v22 = vld [vmem:[%s3600_s0 + $0xd8] sm:$0xff] }
   0x8   :  { %v35_v19 = vld [vmem:[%s3600_s0 + $0x48] sm:$0xff]  ;;  %v36_v21 = vld [vmem:[%s3600_s0 + $0x50] sm:$0xff]  ;;  %v37_v23 = vld [vmem:[%s3600_s0 + $0x58] sm:$0xff] }
   0x9   :  { %v54_v24 = vld [vmem:[%s3600_s0 + $0xe0] sm:$0xff]  ;;  %v2051_v30 = vld [vmem:[%s3601_s3 + $0x48] sm:$0xff]   ;;  %v2052_v36 = vld [vmem:[%s3601_s3 + $0x50] sm:$0xff]  }
   0xa   :  { %144 = vxpose.xlu0.b32.cont [3/16] (narrow) %v44_v4, 56  ;;  %v38_v25 = vld [vmem:[%s3600_s0 + $0x60] sm:$0xff]  ;;  %v2067_v31 = vld [vmem:[%s3601_s3 + $0xc8] sm:$0xff]   ;;  %v2068_v37 = vld [vmem:[%s3601_s3 + $0xd0] sm:$0xff]  }
   0xb   :  { %112 = vxpose.xlu1.b32.cont [3/16] (narrow) %v28_v5, 56  ;;  %v2050_v26 = vld [vmem:[%s3601_s3 + $0x40] sm:$0xff]   ;;  %v2043_v32 = vld [vmem:[%s3601_s3 + $0x8] sm:$0xff]   ;;  %v2044_v38 = vld [vmem:[%s3601_s3 + $0x10] sm:$0xff]  }
   0xc   :  { %v2066_v27 = vld [vmem:[%s3601_s3 + $0xc0] sm:$0xff]   ;;  %2219 = vmatprep.subr.bf16.mxu0 %v2050_v26  ;;  %v55_v33 = vld [vmem:[%s3600_s0 + $0xe8] sm:$0xff]  ;;  %v56_v39 = vld [vmem:[%s3600_s0 + $0xf0] sm:$0xff] }
   0xd   :  { %v1876_v28 = vld [vmem:[%s3601_s3] sm:$0xff]   ;;  %2251 = vmatprep.subr.bf16.mxu1 %v2066_v27  ;;  %v39_v34 = vld [vmem:[%s3600_s0 + $0x68] sm:$0xff]  ;;  %v40_v40 = vld [vmem:[%s3600_s0 + $0x70] sm:$0xff] }
   0xe   :  { %145 = vxpose.xlu0.b32.cont [4/16] (narrow) %v45_v6, 56  ;;  %v2058_v29 = vld [vmem:[%s3601_s3 + $0x80] sm:$0xff]   ;;  %2221 = vmatpush3.bf16.msra.mxu0 %v1876_v28  ;;  %v2059_v35 = vld [vmem:[%s3601_s3 + $0x88] sm:$0xff]   ;;  %v2060_v41 = vld [vmem:[%s3601_s3 + $0x90] sm:$0xff]  }
   0xf   :  { %113 = vxpose.xlu1.b32.cont [4/16] (narrow) %v29_v7, 56  ;;  %2253 = vmatpush3.bf16.msra.mxu1 %v2058_v29  ;;  %v2053_v42 = vld [vmem:[%s3601_s3 + $0x58] sm:$0xff]   ;;  %v2054_v48 = vld [vmem:[%s3601_s3 + $0x60] sm:$0xff]   ;;  %v2055_v54 = vld [vmem:[%s3601_s3 + $0x68] sm:$0xff]   ;;  %v304_v29 = vlaneseq }
  0x10   :  { %2223 = vmatprep.subr.bf16.mxu0 %v2051_v30  ;;  %2255 = vmatprep.subr.bf16.mxu1 %v2067_v31  ;;  %v2069_v43 = vld [vmem:[%s3601_s3 + $0xd8] sm:$0xff]   ;;  %v2070_v49 = vld [vmem:[%s3601_s3 + $0xe0] sm:$0xff]   ;;  %v2071_v55 = vld [vmem:[%s3601_s3 + $0xe8] sm:$0xff]  }
  0x11   :  { %v2045_v44 = vld [vmem:[%s3601_s3 + $0x18] sm:$0xff]   ;;  %v2046_v50 = vld [vmem:[%s3601_s3 + $0x20] sm:$0xff]   ;;  %v2047_v56 = vld [vmem:[%s3601_s3 + $0x28] sm:$0xff]  }
  0x12   :  { %146 = vxpose.xlu0.b32.cont [5/16] (narrow) %v46_v8, 56  ;;  %2225 = vmatpush3.bf16.msra.mxu0 %v2043_v32  ;;  %v57_v45 = vld [vmem:[%s3600_s0 + $0xf8] sm:$0xff]  ;;  %v74_v51 = vld [vmem:[%s3600_s0 + $0x180] sm:$0xff]  ;;  %v2063_v57 = vld [vmem:[%s3601_s3 + $0xa8] sm:$0xff]   ;;  %v2746_v32 = vshrl.u32 %v304_v29, 7 }
  0x13   :  { %114 = vxpose.xlu1.b32.cont [5/16] (narrow) %v30_v9, 56  ;;  %2257 = vmatpush3.bf16.msra.mxu1 %v2059_v35  ;;  %v41_v46 = vld [vmem:[%s3600_s0 + $0x78] sm:$0xff]  ;;  %v58_v52 = vld [vmem:[%s3600_s0 + $0x100] sm:$0xff]  ;;  %v75_v58 = vld [vmem:[%s3600_s0 + $0x188] sm:$0xff] }
  0x14   :  { %2227 = vmatprep.subr.bf16.mxu0 %v2052_v36  ;;  %2259 = vmatprep.subr.bf16.mxu1 %v2068_v37  ;;  %v2061_v47 = vld [vmem:[%s3601_s3 + $0x98] sm:$0xff]   ;;  %v2062_v53 = vld [vmem:[%s3601_s3 + $0xa0] sm:$0xff]   ;;  %v59_v59 = vld [vmem:[%s3600_s0 + $0x108] sm:$0xff]  ;;  %v310_v35 = vsub.s32 1, %v2746_v32  ;;  %v306_v36 = vsub.s32 0, %v2746_v32 }
  0x15   :  { %v2056_v60 = vld [vmem:[%s3601_s3 + $0x70] sm:$0xff]   ;;  %v2057_v2 = vld [vmem:[%s3601_s3 + $0x78] sm:$0xff]   ;;  %v78_v8 = vld [vmem:[%s3600_s0 + $0x1a0] sm:$0xff] }
  0x16   :  { %147 = vxpose.xlu0.b32.cont [6/16] (narrow) %v47_v10, 56  ;;  %2229 = vmatpush3.bf16.msra.mxu0 %v2044_v38  ;;  %v2072_v61 = vld [vmem:[%s3601_s3 + $0xf0] sm:$0xff]   ;;  %v2073_v3 = vld [vmem:[%s3601_s3 + $0xf8] sm:$0xff]   ;;  %v62_v9 = vld [vmem:[%s3600_s0 + $0x120] sm:$0xff] }
  0x17   :  { %115 = vxpose.xlu1.b32.cont [6/16] (narrow) %v31_v11, 56  ;;  %2261 = vmatpush3.bf16.msra.mxu1 %v2060_v41  ;;  %v2048_v62 = vld [vmem:[%s3601_s3 + $0x30] sm:$0xff]   ;;  %v77_v4 = vld [vmem:[%s3600_s0 + $0x198] sm:$0xff]  ;;  %v79_v10 = vld [vmem:[%s3600_s0 + $0x1a8] sm:$0xff] }
  0x18   :  { %2231 = vmatprep.subr.bf16.mxu0 %v2053_v42  ;;  %2263 = vmatprep.subr.bf16.mxu1 %v2069_v43  ;;  %v2064_v63 = vld [vmem:[%s3601_s3 + $0xb0] sm:$0xff]   ;;  %v61_v5 = vld [vmem:[%s3600_s0 + $0x118] sm:$0xff]  ;;  %v63_v11 = vld [vmem:[%s3600_s0 + $0x128] sm:$0xff] }
  0x19   :  { %v76_v0 = vld [vmem:[%s3600_s0 + $0x190] sm:$0xff]  ;;  %v2049_v6 = vld [vmem:[%s3601_s3 + $0x38] sm:$0xff]   ;;  %v70_v26 = vld [vmem:[%s3600_s0 + $0x160] sm:$0xff] }
  0x1a   :  { %148 = vxpose.xlu0.b32.cont [7/16] (narrow) %v48_v12, 56  ;;  %2233 = vmatpush3.bf16.msra.mxu0 %v2045_v44  ;;  %v60_v1 = vld [vmem:[%s3600_s0 + $0x110] sm:$0xff]  ;;  %v2065_v7 = vld [vmem:[%s3601_s3 + $0xb8] sm:$0xff]   ;;  %v87_v27 = vld [vmem:[%s3600_s0 + $0x1e8] sm:$0xff] }
  0x1b   :  { %116 = vxpose.xlu1.b32.cont [7/16] (narrow) %v32_v13, 56  ;;  %2265 = vmatpush3.bf16.msra.mxu1 %v2061_v47  ;;  %v80_v12 = vld [vmem:[%s3600_s0 + $0x1b0] sm:$0xff]  ;;  %v71_v28 = vld [vmem:[%s3600_s0 + $0x168] sm:$0xff]  ;;  %v2759_v37 = vld [vmem:[%s3602_s1] sm:$0x3f] }
  0x1c   :  { %2235 = vmatprep.subr.bf16.mxu0 %v2054_v48  ;;  %2267 = vmatprep.subr.bf16.mxu1 %v2070_v49  ;;  %v64_v13 = vld [vmem:[%s3600_s0 + $0x130] sm:$0xff]  ;;  %v2764_v38 = vld [vmem:[%s3603_s2] sm:$0x3f]  ;;  %v2773_v41 = vrot.slane %v2759_v37, %v310_v35  ;;  %v2776_v42 = vrot.slane %v2759_v37, %v306_v36  ;;  %v107_v47 = vld [vmem:[%s3600_s0 + $0x288] sm:$0xff] }
  0x1d   :  { %v88_v30 = vld [vmem:[%s3600_s0 + $0x1f0] sm:$0xff]  ;;  %v2779_v43 = vrot.slane %v2764_v38, %v306_v36  ;;  %v2782_v44 = vrot.slane %v2764_v38, %v310_v35  ;;  %v91_v48 = vld [vmem:[%s3600_s0 + $0x208] sm:$0xff] }
  0x1e   :  { %149 = vxpose.xlu0.b32.cont [8/16] (narrow) %v49_v14, 56  ;;  %2237 = vmatpush3.bf16.msra.mxu0 %v2046_v50  ;;  %v81_v14 = vld [vmem:[%s3600_s0 + $0x1b8] sm:$0xff]  ;;  %v72_v31 = vld [vmem:[%s3600_s0 + $0x170] sm:$0xff] }
  0x1f   :  { %117 = vxpose.xlu1.b32.cont [8/16] (narrow) %v33_v15, 56  ;;  %2269 = vmatpush3.bf16.msra.mxu1 %v2062_v53  ;;  %v65_v15 = vld [vmem:[%s3600_s0 + $0x138] sm:$0xff]  ;;  %v96_v35 = vld [vmem:[%s3600_s0 + $0x230] sm:$0xff] }
  0x20   :  { %2239 = vmatprep.subr.bf16.mxu0 %v2055_v54  ;;  %2271 = vmatprep.subr.bf16.mxu1 %v2071_v55  ;;  %v108_v55 = vld [vmem:[%s3600_s0 + $0x290] sm:$0xff] }
  0x22   :  { %150 = vxpose.xlu0.b32.cont [9/16] (narrow) %v50_v16, 56  ;;  %2241 = vmatpush3.bf16.msra.mxu0 %v2047_v56  ;;  %v82_v16 = vld [vmem:[%s3600_s0 + $0x1c0] sm:$0xff]  ;;  %v92_v56 = vld [vmem:[%s3600_s0 + $0x210] sm:$0xff] }
  0x23   :  { %118 = vxpose.xlu1.b32.cont [9/16] (narrow) %v34_v17, 56  ;;  %2273 = vmatpush3.bf16.msra.mxu1 %v2063_v57  ;;  %v66_v17 = vld [vmem:[%s3600_s0 + $0x140] sm:$0xff] }
  0x24   :  { %2243 = vmatprep.subr.bf16.mxu0 %v2056_v60  ;;  %2275 = vmatprep.subr.bf16.mxu1 %v2072_v61 }
  0x26   :  { %151 = vxpose.xlu0.b32.cont [10/16] (narrow) %v51_v18, 56  ;;  %2245 = vmatpush3.bf16.msra.mxu0 %v2048_v62  ;;  %v2419_v18 = vmov 0.0|0.0  }
  0x27   :  { %119 = vxpose.xlu1.b32.cont [10/16] (narrow) %v35_v19, 56  ;;  %2277 = vmatpush3.bf16.msra.mxu1 %v2064_v63  ;;  %v83_v19 = vld [vmem:[%s3600_s0 + $0x1c8] sm:$0xff]  ;;  %v2074_v63 = vld [vmem:[%s3601_s3 + $0x100] sm:$0xff]  }
  0x28   :  { %2247 = vmatprep.subr.bf16.mxu0 %v2057_v2  ;;  %2279 = vmatprep.subr.bf16.mxu1 %v2073_v3  ;;  %v109_v2 = vld [vmem:[%s3600_s0 + $0x298] sm:$0xff] }
  0x29   :  { %v93_v3 = vld [vmem:[%s3600_s0 + $0x218] sm:$0xff] }
  0x2a   :  { %152 = vxpose.xlu0.b32.cont [11/16] (narrow) %v52_v20, 56  ;;  %2249 = vmatpush3.bf16.msra.mxu0 %v2049_v6  ;;  %v67_v20 = vld [vmem:[%s3600_s0 + $0x148] sm:$0xff] }
  0x2b   :  { %120 = vxpose.xlu1.b32.cont [11/16] (narrow) %v36_v21, 56  ;;  %2281 = vmatpush3.bf16.msra.mxu1 %v2065_v7  ;;  %v84_v21 = vld [vmem:[%s3600_s0 + $0x1d0] sm:$0xff] }
  0x2c   :  { %2282 = vmatprep.subr.bf16.mxu0 %v2419_v18 }
  0x2e   :  { %153 = vxpose.xlu0.b32.cont [12/16] (narrow) %v53_v22, 56  ;;  %v68_v22 = vld [vmem:[%s3600_s0 + $0x150] sm:$0xff] }
  0x2f   :  { %121 = vxpose.xlu1.b32.cont [12/16] (narrow) %v37_v23, 56  ;;  %v85_v23 = vld [vmem:[%s3600_s0 + $0x1d8] sm:$0xff] }
  0x32   :  { %154 = vxpose.xlu0.b32.cont [13/16] (narrow) %v54_v24, 56  ;;  %v69_v24 = vld [vmem:[%s3600_s0 + $0x158] sm:$0xff] }
  0x33   :  { %122 = vxpose.xlu1.b32.cont [13/16] (narrow) %v38_v25, 56  ;;  %v86_v25 = vld [vmem:[%s3600_s0 + $0x1e0] sm:$0xff] }
  0x36   :  { %155 = vxpose.xlu0.b32.cont [14/16] (narrow) %v55_v33, 56  ;;  %v89_v33 = vld [vmem:[%s3600_s0 + $0x1f8] sm:$0xff] }
  0x37   :  { %123 = vxpose.xlu1.b32.cont [14/16] (narrow) %v39_v34, 56  ;;  %v73_v34 = vld [vmem:[%s3600_s0 + $0x178] sm:$0xff] }
  0x3a   :  { %156 = vxpose.xlu0.b32.cont [15/16] (narrow) %v56_v39, 56  ;;  %v106_v39 = vld [vmem:[%s3600_s0 + $0x280] sm:$0xff] }
  0x3b   :  { %124 = vxpose.xlu1.b32.cont [15/16] (narrow) %v40_v40, 56  ;;  %v90_v40 = vld [vmem:[%s3600_s0 + $0x200] sm:$0xff] }
  0x3e   :  { %157 = vxpose.xlu0.b32.end [16/16] (narrow) %v57_v45, 56 }
  0x3f   :  { %125 = vxpose.xlu1.b32.end [16/16] (narrow) %v41_v46, 56 }
  0x42   :  { %206 = vxpose.xlu0.b32.start [1/16] (narrow) %v74_v51, 56 }
  0x43   :  { %174 = vxpose.xlu1.b32.start [1/16] (narrow) %v58_v52, 56 }
  0x46   :  { %207 = vxpose.xlu0.b32.cont [2/16] (narrow) %v75_v58, 56 }
  0x47   :  { %175 = vxpose.xlu1.b32.cont [2/16] (narrow) %v59_v59, 56 }
  0x4a   :  { %208 = vxpose.xlu0.b32.cont [3/16] (narrow) %v76_v0, 56 }
  0x4b   :  { %176 = vxpose.xlu1.b32.cont [3/16] (narrow) %v60_v1, 56 }
  0x4e   :  { %209 = vxpose.xlu0.b32.cont [4/16] (narrow) %v77_v4, 56 }
  0x4f   :  { %177 = vxpose.xlu1.b32.cont [4/16] (narrow) %v61_v5, 56 }
  0x52   :  { %210 = vxpose.xlu0.b32.cont [5/16] (narrow) %v78_v8, 56 }
  0x53   :  { %178 = vxpose.xlu1.b32.cont [5/16] (narrow) %v62_v9, 56 }
  0x56   :  { %211 = vxpose.xlu0.b32.cont [6/16] (narrow) %v79_v10, 56  ;;  %v2075_v10 = vld [vmem:[%s3601_s3 + $0x108] sm:$0xff]  }
  0x57   :  { %179 = vxpose.xlu1.b32.cont [6/16] (narrow) %v63_v11, 56 }
  0x5a   :  { %212 = vxpose.xlu0.b32.cont [7/16] (narrow) %v80_v12, 56 }
  0x5b   :  { %180 = vxpose.xlu1.b32.cont [7/16] (narrow) %v64_v13, 56  ;;  %v94_v13 = vld [vmem:[%s3600_s0 + $0x220] sm:$0xff] }
  0x5e   :  { %213 = vxpose.xlu0.b32.cont [8/16] (narrow) %v81_v14, 56 }
  0x5f   :  { %181 = vxpose.xlu1.b32.cont [8/16] (narrow) %v65_v15, 56 }
  0x62   :  { %214 = vxpose.xlu0.b32.cont [9/16] (narrow) %v82_v16, 56 }
  0x63   :  { %182 = vxpose.xlu1.b32.cont [9/16] (narrow) %v66_v17, 56 }
  0x66   :  { %215 = vxpose.xlu0.b32.cont [10/16] (narrow) %v83_v19, 56 }
  0x67   :  { %183 = vxpose.xlu1.b32.cont [10/16] (narrow) %v67_v20, 56 }
  0x6a   :  { %216 = vxpose.xlu0.b32.cont [11/16] (narrow) %v84_v21, 56  ;;  %v2076_v21 = vld [vmem:[%s3601_s3 + $0x110] sm:$0xff]  }
  0x6b   :  { %184 = vxpose.xlu1.b32.cont [11/16] (narrow) %v68_v22, 56 }
  0x6e   :  { %217 = vxpose.xlu0.b32.cont [12/16] (narrow) %v85_v23, 56 }
  0x6f   :  { %185 = vxpose.xlu1.b32.cont [12/16] (narrow) %v69_v24, 56  ;;  %v95_v24 = vld [vmem:[%s3600_s0 + $0x228] sm:$0xff] }
  0x72   :  { %218 = vxpose.xlu0.b32.cont [13/16] (narrow) %v86_v25, 56 }
  0x73   :  { %186 = vxpose.xlu1.b32.cont [13/16] (narrow) %v70_v26, 56 }
  0x76   :  { %219 = vxpose.xlu0.b32.cont [14/16] (narrow) %v87_v27, 56 }
  0x77   :  { %187 = vxpose.xlu1.b32.cont [14/16] (narrow) %v71_v28, 56 }
  0x7a   :  { %220 = vxpose.xlu0.b32.cont [15/16] (narrow) %v88_v30, 56 }
  0x7b   :  { %188 = vxpose.xlu1.b32.cont [15/16] (narrow) %v72_v31, 56  ;;  %v2077_v31 = vld [vmem:[%s3601_s3 + $0x118] sm:$0xff]  }
  0x7e   :  { %221 = vxpose.xlu0.b32.end [16/16] (narrow) %v89_v33, 56 }
  0x7f   :  { %189 = vxpose.xlu1.b32.end [16/16] (narrow) %v73_v34, 56 }
  0x82   :  { %270 = vxpose.xlu0.b32.start [1/4] (short) (narrow) %v106_v39, 56  ;;  %v158_v45 = vpop.trf.xlu0 }
  0x83   :  { %238 = vxpose.xlu1.b32.start [1/16] (narrow) %v90_v40, 56  ;;  %v126_v46 = vpop.trf.xlu1  ;;  %v335_v49 = vmul.f32 %v2773_v41, %v158_v45 }
  0x84   :  { %v334_v50 = vmul.f32 %v2776_v42, %v126_v46 }
  0x85   :  { %v409_v52 = vadd.f32 %v2782_v44, %v335_v49 }
  0x86   :  { %v408_v51 = vadd.f32 %v2779_v43, %v334_v50  ;;  %271 = vxpose.xlu0.b32.cont [2/4] (short) (narrow) %v107_v47, 56  ;;  %v159_v53 = vpop.trf.xlu0 }
  0x87   :  { %239 = vxpose.xlu1.b32.cont [2/16] (narrow) %v91_v48, 56  ;;  %v127_v54 = vpop.trf.xlu1  ;;  %v341_v58 = vmul.f32 %v2773_v41, %v159_v53  ;;  %v451_v60 = vmax.f32 %v409_v52, 0.0  ;;  %v2078_v48 = vld [vmem:[%s3601_s3 + $0x120] sm:$0xff]  }
  0x88   :  { %v450_v57 = vmax.f32 %v408_v51, 0.0  ;;  %v340_v59 = vmul.f32 %v2776_v42, %v127_v54  ;;  %v97_v51 = vld [vmem:[%s3600_s0 + $0x238] sm:$0xff] }
  0x89   :  { %v415_v61 = vadd.f32 %v2782_v44, %v341_v58  ;;  %746 = vmatprep.mubr.f32.mxu0 %v451_v60  ;;  %v2079_v58 = vld [vmem:[%s3601_s3 + $0x128] sm:$0xff]   ;;  %v2081_v60 = vld [vmem:[%s3601_s3 + $0x138] sm:$0xff]  }
  0x8a   :  { %v414_v62 = vadd.f32 %v2779_v43, %v340_v59  ;;  %272 = vxpose.xlu0.b32.cont [3/4] (short) (narrow) %v108_v55, 56  ;;  %v160_v0 = vpop.trf.xlu0  ;;  %747 = vmatmul.mubr.f32.vlgmr.msra.gmra.mrb[0].mxu0 %v450_v57 }
  0x8b   :  { %240 = vxpose.xlu1.b32.cont [3/16] (narrow) %v92_v56, 56  ;;  %v128_v1 = vpop.trf.xlu1  ;;  %v457_v4 = vmax.f32 %v415_v61, 0.0  ;;  %v347_v6 = vmul.f32 %v2773_v41, %v160_v0  ;;  %2284 = vmatpush1.bf16.msra.mxu0 %v2074_v63  ;;  %v100_v61 = vld [vmem:[%s3600_s0 + $0x250] sm:$0xff]  ;;  %v101_v63 = vld [vmem:[%s3600_s0 + $0x258] sm:$0xff]  ;;  %v2083_v0 = vld [vmem:[%s3601_s3 + $0x148] sm:$0xff]  }
  0x8c   :  { %v456_v5 = vmax.f32 %v414_v62, 0.0  ;;  %v346_v7 = vmul.f32 %v2776_v42, %v128_v1  ;;  %2285 = vmatprep.subr.bf16.mxu0 %v2419_v18  ;;  %v2082_v62 = vld [vmem:[%s3601_s3 + $0x140] sm:$0xff]  }
  0x8d   :  { %v421_v8 = vadd.f32 %v2782_v44, %v347_v6  ;;  %751 = vmatprep.mubr.f32.mxu0 %v457_v4  ;;  %v102_v1 = vld [vmem:[%s3600_s0 + $0x260] sm:$0xff]  ;;  %v318_v4 = vsub.s32 3, %v2746_v32 }
  0x8e   :  { %v420_v9 = vadd.f32 %v2779_v43, %v346_v7  ;;  %273 = vxpose.xlu0.b32.end [4/4] (short) (narrow) %v109_v2, 56  ;;  %v161_v11 = vpop.trf.xlu0  ;;  %752 = vmatmul.mubr.f32.gmra.mrb[2].mxu0 %v456_v5  ;;  %v103_v2 = vld [vmem:[%s3600_s0 + $0x268] sm:$0xff]  ;;  %v314_v5 = vsub.s32 2, %v2746_v32 }
  0x8f   :  { %241 = vxpose.xlu1.b32.cont [4/16] (narrow) %v93_v3, 56  ;;  %v129_v12 = vpop.trf.xlu1  ;;  %v463_v14 = vmax.f32 %v421_v8, 0.0  ;;  %v353_v16 = vmul.f32 %v2773_v41, %v161_v11  ;;  %2287 = vmatpush1.bf16.msra.mxu0 %v2075_v10  ;;  %v105_v3 = vld [vmem:[%s3600_s0 + $0x278] sm:$0xff]  ;;  %v2908_v6 = vrot.slane %v2759_v37, %v318_v4 }
  0x90   :  { %v462_v15 = vmax.f32 %v420_v9, 0.0  ;;  %v352_v17 = vmul.f32 %v2776_v42, %v129_v12  ;;  %2288 = vmatprep.subr.bf16.mxu0 %v2419_v18  ;;  %v2911_v7 = vrot.slane %v2759_v37, %v314_v5  ;;  %v2914_v8 = vrot.slane %v2764_v38, %v314_v5 }
  0x91   :  { %v427_v19 = vadd.f32 %v2782_v44, %v353_v16  ;;  %756 = vmatprep.mubr.f32.mxu0 %v463_v14  ;;  %v2917_v9 = vrot.slane %v2764_v38, %v318_v4  ;;  %v326_v5 = vsub.s32 5, %v2746_v32 }
  0x92   :  { %v426_v20 = vadd.f32 %v2779_v43, %v352_v17  ;;  %v162_v22 = vpop.trf.xlu0  ;;  %757 = vmatmul.mubr.f32.gmra.mrb[4].mxu0 %v462_v15 }
  0x93   :  { %242 = vxpose.xlu1.b32.cont [5/16] (narrow) %v94_v13, 56  ;;  %v130_v23 = vpop.trf.xlu1  ;;  %v469_v25 = vmax.f32 %v427_v19, 0.0  ;;  %v359_v27 = vmul.f32 %v2773_v41, %v162_v22  ;;  %2290 = vmatpush1.bf16.msra.mxu0 %v2076_v21 }
  0x94   :  { %v468_v26 = vmax.f32 %v426_v20, 0.0  ;;  %v358_v28 = vmul.f32 %v2776_v42, %v130_v23  ;;  %2291 = vmatprep.subr.bf16.mxu0 %v2419_v18 }
  0x95   :  { %v433_v29 = vadd.f32 %v2782_v44, %v359_v27  ;;  %761 = vmatprep.mubr.f32.mxu0 %v469_v25 }
  0x96   :  { %v432_v30 = vadd.f32 %v2779_v43, %v358_v28  ;;  %v163_v33 = vpop.trf.xlu0  ;;  %762 = vmatmul.mubr.f32.gmra.mrb[6].mxu0 %v468_v26 }
  0x97   :  { %243 = vxpose.xlu1.b32.cont [6/16] (narrow) %v95_v24, 56  ;;  %v131_v34 = vpop.trf.xlu1  ;;  %v475_v36 = vmax.f32 %v433_v29, 0.0  ;;  %v365_v40 = vmul.f32 %v2773_v41, %v163_v33  ;;  %2293 = vmatpush1.bf16.msra.mxu0 %v2077_v31 }
  0x98   :  { %v474_v39 = vmax.f32 %v432_v30, 0.0  ;;  %v364_v45 = vmul.f32 %v2776_v42, %v131_v34  ;;  %2294 = vmatprep.subr.bf16.mxu0 %v2419_v18 }
  0x99   :  { %v439_v46 = vadd.f32 %v2782_v44, %v365_v40  ;;  %766 = vmatprep.mubr.f32.mxu0 %v475_v36 }
  0x9a   :  { %v438_v47 = vadd.f32 %v2779_v43, %v364_v45  ;;  %v164_v49 = vpop.trf.xlu0  ;;  %767 = vmatmul.mubr.f32.gmra.mrb[8].mxu0 %v474_v39 }
  0x9b   :  { %244 = vxpose.xlu1.b32.cont [7/16] (narrow) %v96_v35, 56  ;;  %v132_v50 = vpop.trf.xlu1  ;;  %v481_v52 = vmax.f32 %v439_v46, 0.0  ;;  %v371_v54 = vmul.f32 %v2773_v41, %v164_v49  ;;  %2296 = vmatpush1.bf16.msra.mxu0 %v2078_v48  ;;  %v98_v41 = vld [vmem:[%s3600_s0 + $0x240] sm:$0xff] }
  0x9c   :  { %v480_v53 = vmax.f32 %v438_v47, 0.0  ;;  %v370_v55 = vmul.f32 %v2776_v42, %v132_v50  ;;  %2297 = vmatprep.subr.bf16.mxu0 %v2419_v18 }
  0x9d   :  { %v445_v56 = vadd.f32 %v2782_v44, %v371_v54  ;;  %771 = vmatprep.mubr.f32.mxu0 %v481_v52  ;;  %v99_v44 = vld [vmem:[%s3600_s0 + $0x248] sm:$0xff] }
  0x9e   :  { %v444_v57 = vadd.f32 %v2779_v43, %v370_v55  ;;  %772 = vmatmul.mubr.f32.gmra.mrb[10].mxu0 %v480_v53  ;;  %v2080_v43 = vld [vmem:[%s3601_s3 + $0x130] sm:$0xff]  }
  0x9f   :  { %245 = vxpose.xlu1.b32.cont [8/16] (narrow) %v97_v51, 56  ;;  %v487_v59 = vmax.f32 %v445_v56, 0.0  ;;  %2299 = vmatpush1.bf16.msra.mxu0 %v2079_v58 }
  0xa0   :  { %v486_v42 = vmax.f32 %v444_v57, 0.0  ;;  %2300 = vmatprep.subr.bf16.mxu0 %v2419_v18 }
  0xa1   :  { %776 = vmatprep.mubr.f32.mxu0 %v487_v59 }
  0xa2   :  { %777 = vmatmul.mubr.f32.gmra.mrb[12].mxu0 %v486_v42 }
  0xa3   :  { %246 = vxpose.xlu1.b32.cont [9/16] (narrow) %v98_v41, 56  ;;  %2302 = vmatpush1.bf16.msra.mxu0 %v2080_v43 }
  0xa4   :  { %2303 = vmatprep.subr.bf16.mxu0 %v2419_v18 }
  0xa7   :  { %247 = vxpose.xlu1.b32.cont [10/16] (narrow) %v99_v44, 56  ;;  %2305 = vmatpush1.bf16.msra.mxu0 %v2081_v60 }
  0xa8   :  { %2306 = vmatprep.subr.bf16.mxu0 %v2419_v18 }
  0xab   :  { %248 = vxpose.xlu1.b32.cont [11/16] (narrow) %v100_v61, 56  ;;  %2308 = vmatpush1.bf16.msra.mxu0 %v2082_v62 }
  0xac   :  { %2309 = vmatprep.subr.bf16.mxu0 %v2419_v18  ;;  %v104_v18 = vld [vmem:[%s3600_s0 + $0x270] sm:$0xff] }
  0xaf   :  { %249 = vxpose.xlu1.b32.cont [12/16] (narrow) %v101_v63, 56  ;;  %2311 = vmatpush1.bf16.msra.mxu0 %v2083_v0 }
  0xb3   :  { %250 = vxpose.xlu1.b32.cont [13/16] (narrow) %v102_v1, 56 }
  0xb7   :  { %251 = vxpose.xlu1.b32.cont [14/16] (narrow) %v103_v2, 56 }
  0xbb   :  { %252 = vxpose.xlu1.b32.cont [15/16] (narrow) %v104_v18, 56 }
  0xbf   :  { %253 = vxpose.xlu1.b32.end [16/16] (narrow) %v105_v3, 56 }
  0xc2   :  { %v222_v10 = vpop.trf.xlu0 }
  0xc3   :  { %v190_v11 = vpop.trf.xlu1  ;;  %v337_v12 = vmul.f32 %v2908_v6, %v222_v10  ;;  %v322_v10 = vsub.s32 4, %v2746_v32 }
  0xc4   :  { %v336_v13 = vmul.f32 %v2911_v7, %v190_v11  ;;  %v2950_v11 = vrot.slane %v2759_v37, %v326_v5 }
  0xc5   :  { %v411_v15 = vadd.f32 %v2917_v9, %v337_v12 }
  0xc6   :  { %v410_v14 = vadd.f32 %v2914_v8, %v336_v13  ;;  %v223_v16 = vpop.trf.xlu0 }
  0xc7   :  { %v191_v17 = vpop.trf.xlu1  ;;  %v343_v20 = vmul.f32 %v2908_v6, %v223_v16  ;;  %v453_v22 = vmax.f32 %v411_v15, 0.0 }
  0xc8   :  { %v452_v19 = vmax.f32 %v410_v14, 0.0  ;;  %v342_v21 = vmul.f32 %v2911_v7, %v191_v17 }
  0xc9   :  { %v417_v23 = vadd.f32 %v2917_v9, %v343_v20  ;;  %846 = vmatprep.mubr.f32.mxu1 %v453_v22 }
  0xca   :  { %v416_v24 = vadd.f32 %v2914_v8, %v342_v21  ;;  %v224_v25 = vpop.trf.xlu0  ;;  %847 = vmatmul.mubr.f32.vlgmr.msra.gmra.mrb[0].mxu1 %v452_v19 }
  0xcb   :  { %v192_v26 = vpop.trf.xlu1  ;;  %v459_v27 = vmax.f32 %v417_v23, 0.0  ;;  %v349_v29 = vmul.f32 %v2908_v6, %v224_v25 }
  0xcc   :  { %v458_v28 = vmax.f32 %v416_v24, 0.0  ;;  %v348_v30 = vmul.f32 %v2911_v7, %v192_v26 }
  0xcd   :  { %v423_v31 = vadd.f32 %v2917_v9, %v349_v29  ;;  %851 = vmatprep.mubr.f32.mxu1 %v459_v27 }
  0xce   :  { %v422_v33 = vadd.f32 %v2914_v8, %v348_v30  ;;  %v225_v34 = vpop.trf.xlu0  ;;  %852 = vmatmul.mubr.f32.gmra.mrb[2].mxu1 %v458_v28 }
  0xcf   :  { %v193_v35 = vpop.trf.xlu1  ;;  %v465_v36 = vmax.f32 %v423_v31, 0.0  ;;  %v355_v40 = vmul.f32 %v2908_v6, %v225_v34 }
  0xd0   :  { %v464_v39 = vmax.f32 %v422_v33, 0.0  ;;  %v354_v45 = vmul.f32 %v2911_v7, %v193_v35 }
  0xd1   :  { %v429_v46 = vadd.f32 %v2917_v9, %v355_v40  ;;  %856 = vmatprep.mubr.f32.mxu1 %v465_v36 }
  0xd2   :  { %v428_v47 = vadd.f32 %v2914_v8, %v354_v45  ;;  %v226_v48 = vpop.trf.xlu0  ;;  %857 = vmatmul.mubr.f32.gmra.mrb[4].mxu1 %v464_v39 }
  0xd3   :  { %v194_v49 = vpop.trf.xlu1  ;;  %v471_v50 = vmax.f32 %v429_v46, 0.0  ;;  %v361_v52 = vmul.f32 %v2908_v6, %v226_v48 }
  0xd4   :  { %v470_v51 = vmax.f32 %v428_v47, 0.0  ;;  %v360_v53 = vmul.f32 %v2911_v7, %v194_v49 }
  0xd5   :  { %v435_v54 = vadd.f32 %v2917_v9, %v361_v52  ;;  %861 = vmatprep.mubr.f32.mxu1 %v471_v50 }
  0xd6   :  { %v434_v55 = vadd.f32 %v2914_v8, %v360_v53  ;;  %v227_v56 = vpop.trf.xlu0  ;;  %862 = vmatmul.mubr.f32.gmra.mrb[6].mxu1 %v470_v51 }
  0xd7   :  { %v195_v57 = vpop.trf.xlu1  ;;  %v477_v58 = vmax.f32 %v435_v54, 0.0  ;;  %v367_v59 = vmul.f32 %v2908_v6, %v227_v56 }
  0xd8   :  { %v476_v41 = vmax.f32 %v434_v55, 0.0  ;;  %v366_v42 = vmul.f32 %v2911_v7, %v195_v57 }
  0xd9   :  { %v441_v43 = vadd.f32 %v2917_v9, %v367_v59  ;;  %866 = vmatprep.mubr.f32.mxu1 %v477_v58 }
  0xda   :  { %v440_v44 = vadd.f32 %v2914_v8, %v366_v42  ;;  %v228_v60 = vpop.trf.xlu0  ;;  %867 = vmatmul.mubr.f32.gmra.mrb[8].mxu1 %v476_v41 }
  0xdb   :  { %v196_v61 = vpop.trf.xlu1  ;;  %v483_v62 = vmax.f32 %v441_v43, 0.0  ;;  %v373_v0 = vmul.f32 %v2908_v6, %v228_v60  ;;  %v2953_v6 = vrot.slane %v2759_v37, %v322_v10 }
  0xdc   :  { %v482_v63 = vmax.f32 %v440_v44, 0.0  ;;  %v372_v1 = vmul.f32 %v2911_v7, %v196_v61  ;;  %v2956_v7 = vrot.slane %v2764_v38, %v326_v5 }
  0xdd   :  { %v447_v2 = vadd.f32 %v2917_v9, %v373_v0  ;;  %871 = vmatprep.mubr.f32.mxu1 %v483_v62 }
  0xde   :  { %v446_v18 = vadd.f32 %v2914_v8, %v372_v1  ;;  %872 = vmatmul.mubr.f32.gmra.mrb[10].mxu1 %v482_v63  ;;  %v2959_v8 = vrot.slane %v2764_v38, %v322_v10 }
  0xdf   :  { %v489_v3 = vmax.f32 %v447_v2, 0.0 }
  0xe0   :  { %v488_v4 = vmax.f32 %v446_v18, 0.0 }
  0xe1   :  { %876 = vmatprep.mubr.f32.mxu1 %v489_v3 }
  0xe2   :  { %877 = vmatmul.mubr.f32.gmra.mrb[12].mxu1 %v488_v4 }
 0x102   :  { %v286_v9 = vpop.trf.xlu0 }
 0x103   :  { %v254_v12 = vpop.trf.xlu1  ;;  %v339_v13 = vmul.f32 %v2950_v11, %v286_v9 }
 0x104   :  { %v338_v14 = vmul.f32 %v2953_v6, %v254_v12 }
 0x105   :  { %v413_v15 = vadd.f32 %v2956_v7, %v339_v13 }
 0x106   :  { %v412_v16 = vadd.f32 %v2959_v8, %v338_v14  ;;  %v287_v17 = vpop.trf.xlu0 }
 0x107   :  { %v255_v19 = vpop.trf.xlu1  ;;  %v455_v37 = vmax.f32 %v413_v15, 0.0  ;;  %v345_v21 = vmul.f32 %v2950_v11, %v287_v17 }
 0x108   :  { %v454_v20 = vmax.f32 %v412_v16, 0.0  ;;  %v344_v38 = vmul.f32 %v2953_v6, %v255_v19 }
 0x109   :  { %v419_v22 = vadd.f32 %v2956_v7, %v345_v21  ;;  %1853 = vmatprep.mubr.msk.f32.mxu0 %vm660_vm0, %v455_v37 }
 0x10a   :  { %v418_v23 = vadd.f32 %v2959_v8, %v344_v38  ;;  %v288_v24 = vpop.trf.xlu0  ;;  %947 = vmatmul.mubr.f32.vlgmr.msra.gmra.mrb[14].mxu0 %v454_v20 }
 0x10b   :  { %v256_v25 = vpop.trf.xlu1  ;;  %v461_v26 = vmax.f32 %v419_v22, 0.0  ;;  %v351_v28 = vmul.f32 %v2950_v11, %v288_v24  ;;  %v2999_v24 = vld [vmem:[%s3604_s6] sm:$0xff] }
 0x10c   :  { %v460_v27 = vmax.f32 %v418_v23, 0.0  ;;  %v350_v29 = vmul.f32 %v2953_v6, %v256_v25  ;;  %v3004_v25 = vld [vmem:[%s3604_s6 + $0x8] sm:$0xff] }
 0x10d   :  { %v425_v30 = vadd.f32 %v2956_v7, %v351_v28  ;;  %1854 = vmatprep.mubr.msk.f32.mxu0 %vm660_vm0, %v461_v26  ;;  %v1384_v26 = vunpack.c.h.bf16 %v2999_v24 }
 0x10e   :  { %v424_v31 = vadd.f32 %v2959_v8, %v350_v29  ;;  %v289_v33 = vpop.trf.xlu0  ;;  %952 = vmatmul.mubr.f32.gmra.mrb[16].mxu0 %v460_v27  ;;  %v1386_v27 = vunpack.c.h.bf16 %v3004_v25 }
 0x10f   :  { %v257_v34 = vpop.trf.xlu1  ;;  %v467_v35 = vmax.f32 %v425_v30, 0.0  ;;  %v357_v39 = vmul.f32 %v2950_v11, %v289_v33 }
 0x110   :  { %v466_v36 = vmax.f32 %v424_v31, 0.0  ;;  %v356_v40 = vmul.f32 %v2953_v6, %v257_v34  ;;  %1568 = vmatprep.mubr.f32.mxu1 %v1386_v27 }
 0x111   :  { %v431_v45 = vadd.f32 %v2956_v7, %v357_v39  ;;  %1855 = vmatprep.mubr.msk.f32.mxu0 %vm660_vm0, %v467_v35 }
 0x112   :  { %v430_v46 = vadd.f32 %v2959_v8, %v356_v40  ;;  %v290_v47 = vpop.trf.xlu0  ;;  %957 = vmatmul.mubr.f32.gmra.mrb[18].mxu0 %v466_v36 }
 0x113   :  { %v258_v48 = vpop.trf.xlu1  ;;  %v473_v49 = vmax.f32 %v431_v45, 0.0  ;;  %v363_v51 = vmul.f32 %v2950_v11, %v290_v47 }
 0x114   :  { %v472_v50 = vmax.f32 %v430_v46, 0.0  ;;  %v362_v52 = vmul.f32 %v2953_v6, %v258_v48 }
 0x115   :  { %v437_v53 = vadd.f32 %v2956_v7, %v363_v51  ;;  %1856 = vmatprep.mubr.msk.f32.mxu0 %vm660_vm0, %v473_v49 }
 0x116   :  { %v436_v54 = vadd.f32 %v2959_v8, %v362_v52  ;;  %v291_v55 = vpop.trf.xlu0  ;;  %962 = vmatmul.mubr.f32.gmra.mrb[20].mxu0 %v472_v50 }
 0x117   :  { %v259_v56 = vpop.trf.xlu1  ;;  %v479_v57 = vmax.f32 %v437_v53, 0.0  ;;  %v369_v41 = vmul.f32 %v2950_v11, %v291_v55 }
 0x118   :  { %v478_v58 = vmax.f32 %v436_v54, 0.0  ;;  %v368_v59 = vmul.f32 %v2953_v6, %v259_v56 }
 0x119   :  { %v443_v42 = vadd.f32 %v2956_v7, %v369_v41  ;;  %1857 = vmatprep.mubr.msk.f32.mxu0 %vm660_vm0, %v479_v57 }
 0x11a   :  { %v442_v43 = vadd.f32 %v2959_v8, %v368_v59  ;;  %v292_v44 = vpop.trf.xlu0  ;;  %967 = vmatmul.mubr.f32.gmra.mrb[22].mxu0 %v478_v58 }
 0x11b   :  { %v260_v60 = vpop.trf.xlu1  ;;  %v485_v61 = vmax.f32 %v443_v42, 0.0  ;;  %v375_v63 = vmul.f32 %v2950_v11, %v292_v44 }
 0x11c   :  { %v484_v62 = vmax.f32 %v442_v43, 0.0  ;;  %v374_v0 = vmul.f32 %v2953_v6, %v260_v60  ;;  %v3023_v44 = vmul.u32.u64.low 2454267026, %v2746_v32  ;;  %v3024_v60 = vmul.u32.u64.high 2454267026, %v2746_v32, %v3023_v44 }
 0x11d   :  { %v449_v1 = vadd.f32 %v2956_v7, %v375_v63  ;;  %1858 = vmatprep.mubr.msk.f32.mxu0 %vm660_vm0, %v485_v61  ;;  %v1019_v61 = vadd.s32 8, %v2746_v32  ;;  %v1021_v63 = vadd.s32 24, %v2746_v32 }
 0x11e   :  { %v448_v2 = vadd.f32 %v2959_v8, %v374_v0  ;;  %972 = vmatmul.mubr.f32.gmra.mrb[24].mxu0 %v484_v62  ;;  %v1020_v62 = vadd.s32 16, %v2746_v32  ;;  %vm1031_vm1 = vc.u32 %v3023_v44, 2454267026  ;;  %v1022_v0 = vadd.s32 32, %v2746_v32 }
 0x11f   :  { %v491_v18 = vmax.f32 %v449_v1, 0.0 }
 0x120   :  { %v490_v3 = vmax.f32 %v448_v2, 0.0  ;;  %v3030_v1 = vmul.u32.u64.low 2454267026, %v1019_v61  ;;  %v3031_v2 = vmul.u32.u64.high 2454267026, %v1019_v61, %v3030_v1 }
 0x121   :  { %1859 = vmatprep.mubr.msk.f32.mxu0 %vm660_vm0, %v491_v18  ;;  %v1023_v18 = vadd.s32 40, %v2746_v32 }
 0x122   :  { %977 = vmatmul.mubr.f32.gmra.mrb[26].mxu0 %v490_v3  ;;  %v2420_v3 = vmov 0   ;;  %vm1045_vm2 = vc.u32 %v3030_v1, 2454267026 }
 0x123   :  { %1483 = vmatprep.mubr.f32.mxu0 %v1384_v26 }
 0x15d   :  { %v2116_v4 = vpop.f32.mrb[0].mxu0 }
 0x15e   :  { %v2117_v5 = vpop.f32.mrb[1].mxu0 }
 0x15f   :  { %v2118_v10 = vadd.f32 %v2117_v5, %v2116_v4  ;;  %v1032_v4 = vsel %vm1031_vm1, 1, %v2420_v3 }
 0x161   :  { %v2119_v9 = vpop.f32.mrb[2].mxu0 }
 0x162   :  { %v2120_v12 = vpop.f32.mrb[3].mxu0 }
 0x163   :  { %v2121_v11 = vadd.f32 %v2120_v12, %v2119_v9  ;;  %v1024_v9 = vadd.s32 48, %v2746_v32 }
 0x165   :  { %v2122_v13 = vpop.f32.mrb[4].mxu0 }
 0x166   :  { %v2123_v6 = vpop.f32.mrb[5].mxu0 }
 0x167   :  { %v2124_v14 = vadd.f32 %v2123_v6, %v2122_v13  ;;  %v3041_v13 = vmul.u32.u64.low 2454267026, %v1022_v0  ;;  %v3042_v6 = vmul.u32.u64.high 2454267026, %v1022_v0, %v3041_v13 }
 0x169   :  { %v2125_v7 = vpop.f32.mrb[6].mxu0  ;;  %vm1087_vm5 = vc.u32 %v3041_v13, 2454267026 }
 0x16a   :  { %v2126_v15 = vpop.f32.mrb[7].mxu0 }
 0x16b   :  { %v2127_v8 = vadd.f32 %v2126_v15, %v2125_v7  ;;  %v3045_v7 = vmul.u32.u64.low 2454267026, %v1023_v18  ;;  %v3046_v15 = vmul.u32.u64.high 2454267026, %v1023_v18, %v3045_v7 }
 0x16d   :  { %v2128_v16 = vpop.f32.mrb[8].mxu0  ;;  %vm1101_vm6 = vc.u32 %v3045_v7, 2454267026 }
 0x16e   :  { %v2129_v17 = vpop.f32.mrb[9].mxu0 }
 0x16f   :  { %v2130_v19 = vadd.f32 %v2129_v17, %v2128_v16  ;;  %v1046_v17 = vsel %vm1045_vm2, 1, %v2420_v3 }
 0x171   :  { %v2131_v37 = vpop.f32.mrb[10].mxu0 }
 0x172   :  { %v2132_v20 = vpop.f32.mrb[11].mxu0 }
 0x173   :  { %v2133_v21 = vadd.f32 %v2132_v20, %v2131_v37 }
 0x175   :  { %v2134_v38 = vpop.f32.mrb[12].mxu0 }
 0x176   :  { %v2135_v22 = vpop.f32.mrb[13].mxu0 }
 0x177   :  { %v2136_v23 = vadd.f32 %v2135_v22, %v2134_v38  ;;  %v1088_v38 = vsel %vm1087_vm5, 1, %v2420_v3 }
 0x19d   :  { %v2169_v28 = vpop.f32.mrb[0].mxu1 }
 0x19e   :  { %v2170_v29 = vpop.f32.mrb[1].mxu1 }
 0x19f   :  { %v2171_v30 = vadd.f32 %v2170_v29, %v2169_v28  ;;  %v1089_v29 = vadd.s32 %v3042_v6, %v1088_v38 }
 0x1a1   :  { %v2172_v31 = vpop.f32.mrb[2].mxu1  ;;  %v3008_v33 = vadd.f32 %v2171_v30, %v2118_v10  ;;  %v3034_v5 = vmul.u32.u64.low 2454267026, %v1020_v62  ;;  %v3035_v10 = vmul.u32.u64.high 2454267026, %v1020_v62, %v3034_v5 }
 0x1a2   :  { %v2173_v34 = vpop.f32.mrb[3].mxu1 }
 0x1a3   :  { %v2174_v35 = vadd.f32 %v2173_v34, %v2172_v31  ;;  %vm1059_vm3 = vc.u32 %v3034_v5, 2454267026  ;;  %v3081_v5 = vld [vmem:[%s3606_s5] ss:$0 sm:$0xff] }
 0x1a4   :  { %v1060_v37 = vsel %vm1059_vm3, 1, %v2420_v3 }
 0x1a5   :  { %v2175_v36 = vpop.f32.mrb[4].mxu1  ;;  %v3010_v39 = vadd.f32 %v2174_v35, %v2121_v11  ;;  %v3038_v12 = vmul.u32.u64.low 2454267026, %v1021_v63  ;;  %v3039_v11 = vmul.u32.u64.high 2454267026, %v1021_v63, %v3038_v12  ;;  %v1061_v22 = vadd.s32 %v3035_v10, %v1060_v37 }
 0x1a6   :  { %v2176_v40 = vpop.f32.mrb[5].mxu1  ;;  %v2421_v10 = vmov 0.0  }
 0x1a7   :  { %v2177_v45 = vadd.f32 %v2176_v40, %v2175_v36  ;;  %vm1073_vm4 = vc.u32 %v3038_v12, 2454267026  ;;  %v1062_v34 = vshrl.u32 %v1061_v22, 2  ;;  %v1279_v13 = vrot.slane %v2421_v10, 7 }
 0x1a8   :  { %v1074_v20 = vsel %vm1073_vm4, 1, %v2420_v3  ;;  %v1253_v38 = vrot.slane %v2421_v10, 2 }
 0x1a9   :  { %v2178_v46 = vpop.f32.mrb[6].mxu1  ;;  %v3012_v47 = vadd.f32 %v2177_v45, %v2124_v14  ;;  %v1033_v14 = vadd.s32 %v3024_v60, %v1032_v4  ;;  %v1075_v27 = vadd.s32 %v3039_v11, %v1074_v20  ;;  %v1090_v45 = vshrl.u32 %v1089_v29, 2 }
 0x1aa   :  { %v2179_v48 = vpop.f32.mrb[7].mxu1 }
 0x1ab   :  { %v2180_v49 = vadd.f32 %v2179_v48, %v2178_v46  ;;  %v1076_v40 = vshrl.u32 %v1075_v27, 2 }
 0x1ad   :  { %v2181_v50 = vpop.f32.mrb[8].mxu1  ;;  %v3014_v51 = vadd.f32 %v2180_v49, %v2127_v8  ;;  %v3048_v8 = vmul.u32.u64.low 2454267026, %v1024_v9  ;;  %v3049_v16 = vmul.u32.u64.high 2454267026, %v1024_v9, %v3048_v8  ;;  %v1063_v49 = vmul.u32 7, %v1062_v34 }
 0x1ae   :  { %v2182_v52 = vpop.f32.mrb[9].mxu1 }
 0x1af   :  { %v2183_v53 = vadd.f32 %v2182_v52, %v2181_v50  ;;  %vm1115_vm7 = vc.u32 %v3048_v8, 2454267026  ;;  %v1077_v52 = vmul.u32 7, %v1076_v40 }
 0x1b0   :  { %v1116_v28 = vsel %vm1115_vm7, 1, %v2420_v3 }
 0x1b1   :  { %v2184_v54 = vpop.f32.mrb[10].mxu1  ;;  %v3016_v55 = vadd.f32 %v2183_v53, %v2130_v19  ;;  %v1034_v19 = vshrl.u32 %v1033_v14, 2  ;;  %v1117_v35 = vadd.s32 %v3049_v16, %v1116_v28  ;;  %v1091_v53 = vmul.u32 7, %v1090_v45 }
 0x1b2   :  { %v2185_v56 = vpop.f32.mrb[11].mxu1 }
 0x1b3   :  { %v2186_v57 = vadd.f32 %v2185_v56, %v2184_v54  ;;  %v1035_v26 = vmul.u32 7, %v1034_v19  ;;  %v1118_v50 = vshrl.u32 %v1117_v35, 2  ;;  %v1092_v44 = vsub.s32 %v1022_v0, %v1091_v53 }
 0x1b5   :  { %v2187_v58 = vpop.f32.mrb[12].mxu1  ;;  %v3018_v41 = vadd.f32 %v2186_v57, %v2133_v21  ;;  %v1047_v21 = vadd.s32 %v3031_v2, %v1046_v17  ;;  %v1036_v36 = vsub.s32 %v2746_v32, %v1035_v26  ;;  %v3063_v2 = vld [vmem:[%s3605_s4] ss:$0 sm:$0xff]  ;;  %vm1127_vm3 = vcmp.ne.s32.totalorder %v1092_v44, 0 }
 0x1b6   :  { %v2188_v59 = vpop.f32.mrb[13].mxu1  ;;  %vm1134_vm4 = vcmp.lt.s32.totalorder %v1092_v44, 0  ;;  %v1148_v8 = vadd.s32 7, %v1092_v44 }
 0x1b7   :  { %v2189_v42 = vadd.f32 %v2188_v59, %v2187_v58  ;;  %v1048_v30 = vshrl.u32 %v1047_v21, 2  ;;  %vm1123_vm8 = vcmp.ne.s32.totalorder %v1036_v36, 0  ;;  %vm1130_vm9 = vcmp.lt.s32.totalorder %v1036_v36, 0 }
 0x1b8   :  { %v1144_v54 = vadd.s32 7, %v1036_v36  ;;  %vm1137_vm10 = vmand %vm1130_vm9, %vm1123_vm8  ;;  %v1064_v58 = vsub.s32 %v1020_v62, %v1063_v49  ;;  %v1119_v59 = vmul.u32 7, %v1118_v50  ;;  %vm1225_vm9 = vcmask 1046528  }
 0x1b9   :  { %v3020_v43 = vadd.f32 %v2189_v42, %v2136_v23  ;;  %v1102_v23 = vsel %vm1101_vm6, 1, %v2420_v3  ;;  %v1049_v46 = vmul.u32 7, %v1048_v30  ;;  %v1078_v42 = vsub.s32 %v1021_v63, %v1077_v52 }
 0x1ba   :  { %v1103_v31 = vadd.s32 %v3046_v15, %v1102_v23  ;;  %v3058_v60 = vsel %vm1137_vm10, %v1144_v54, %v1036_v36  ;;  %vm1125_vm13 = vcmp.ne.s32.totalorder %v1064_v58, 0  ;;  %vm1132_vm14 = vcmp.lt.s32.totalorder %v1064_v58, 0 }
 0x1bb   :  { %v1050_v56 = vsub.s32 %v1019_v61, %v1049_v46  ;;  %v1120_v1 = vsub.s32 %v1024_v9, %v1119_v59  ;;  %vm1126_vm15 = vcmp.ne.s32.totalorder %v1078_v42, 0  ;;  %vm1133_vm0 = vcmp.lt.s32.totalorder %v1078_v42, 0  ;;  %vm3074_vm6 = vmand %vm1132_vm14, %vm1125_vm13 }
 0x1bc   :  { %v1104_v48 = vshrl.u32 %v1103_v31, 2  ;;  %vm1158_vm1 = vcmp.ne.s32.totalorder %v3058_v60, 6  ;;  %v1146_v0 = vadd.s32 7, %v1064_v58  ;;  %vm1186_vm5 = vcmp.ne.s32.totalorder %v3058_v60, 0  ;;  %vm3085_vm10 = vmand %vm1133_vm0, %vm1126_vm15 }
 0x1bd   :  { %vm1124_vm11 = vcmp.ne.s32.totalorder %v1050_v56, 0  ;;  %vm1131_vm12 = vcmp.lt.s32.totalorder %v1050_v56, 0  ;;  %v1145_v61 = vadd.s32 7, %v1050_v56  ;;  %v1226_v9 = vrot.slane %v2421_v10, 1  ;;  %vm3096_vm13 = vmand %vm1134_vm4, %vm1127_vm3 }
 0x1be   :  { %v1105_v57 = vmul.u32 7, %v1104_v48  ;;  %vm3066_vm2 = vmand %vm1131_vm12, %vm1124_vm11  ;;  %vm1129_vm11 = vcmp.ne.s32.totalorder %v1120_v1, 0  ;;  %vm1136_vm12 = vcmp.lt.s32.totalorder %v1120_v1, 0  ;;  %v1147_v6 = vadd.s32 7, %v1078_v42 }
 0x1bf   :  { %v3092_v11 = vsel %vm3066_vm2, %v1145_v61, %v1050_v56  ;;  %v3102_v15 = vsel %vm3074_vm6, %v1146_v0, %v1064_v58  ;;  %v1150_v19 = vadd.s32 7, %v1120_v1  ;;  %vm1214_vm15 = vcmask 1040384   ;;  %vm1143_vm0 = vmand %vm1136_vm12, %vm1129_vm11 }
 0x1c0   :  { %v1106_v32 = vsub.s32 %v1023_v18, %v1105_v57  ;;  %vm1159_vm2 = vcmp.ne.s32.totalorder %v3092_v11, 6  ;;  %vm1187_vm3 = vcmp.ne.s32.totalorder %v3092_v11, 0  ;;  %vm1252_vm4 = vcmask 1045504   ;;  %v1369_v11 = vld [vmem:[%s3604_s6 + $0x2c] sm:$0xff] }
 0x1c1   :  { %vm1160_vm6 = vcmp.ne.s32.totalorder %v3102_v15, 6  ;;  %v3127_v27 = vsel %vm3096_vm13, %v1148_v8, %v1092_v44  ;;  %v3133_v29 = vsel %vm1143_vm0, %v1150_v19, %v1120_v1  ;;  %vm2422_vm12 = vmmov 1  }
 0x1c2   :  { %vm1128_vm7 = vcmp.ne.s32.totalorder %v1106_v32, 0  ;;  %vm1135_vm8 = vcmp.lt.s32.totalorder %v1106_v32, 0  ;;  %v1149_v17 = vadd.s32 7, %v1106_v32  ;;  %vm1190_vm11 = vcmp.ne.s32.totalorder %v3127_v27, 0  ;;  %vm3183_vm13 = vmpackc.low %vm1158_vm1, %vm2422_vm12 }
 0x1c3   :  { %vm3106_vm14 = vmand %vm1135_vm8, %vm1128_vm7  ;;  %vm1188_vm7 = vcmp.ne.s32.totalorder %v3102_v15, 0  ;;  %vm1164_vm0 = vcmp.ne.s32.totalorder %v3133_v29, 6  ;;  %vm1192_vm12 = vcmp.ne.s32.totalorder %v3133_v29, 0 }
 0x1c4   :  { %v3131_v28 = vsel %vm3106_vm14, %v1149_v17, %v1106_v32 }
 0x1c5   :  { %vm1191_vm14 = vcmp.ne.s32.totalorder %v3131_v28, 0 }
 0x1dd   :  { %v948_v62 = vpop.f32.mrb[14].mxu0 }
 0x1de   :  { %v949_v18 = vadd.f32 %v948_v62, %v3008_v33  ;;  %v950_v3 = vpop.f32.mrb[15].mxu0 }
 0x1e0   :  { %v989_v12 = vmul.f32 %v3063_v2, %v949_v18 }
 0x1e1   :  { %v953_v7 = vpop.f32.mrb[16].mxu0 }
 0x1e2   :  { %v1003_v37 = vadd.f32 %v3081_v5, %v989_v12  ;;  %v954_v20 = vadd.f32 %v953_v7, %v3010_v39  ;;  %v955_v21 = vpop.f32.mrb[17].mxu0  ;;  %v3122_v39 = vsel %vm3085_vm10, %v1147_v6, %v1078_v42 }
 0x1e3   :  { %vm1161_vm8 = vcmp.ne.s32.totalorder %v3122_v39, 6  ;;  %vm1189_vm10 = vcmp.ne.s32.totalorder %v3122_v39, 0  ;;  %v1374_v39 = vld [vmem:[%s3604_s6 + $0x50] sm:$0xff] }
 0x1e4   :  { %v3116_v22 = vmax.f32 %v1003_v37, 0.0  ;;  %v990_v23 = vmul.f32 %v3063_v2, %v954_v20 }
 0x1e5   :  { %v958_v26 = vpop.f32.mrb[18].mxu0 }
 0x1e6   :  { %v1004_v30 = vadd.f32 %v3081_v5, %v990_v23  ;;  %v959_v31 = vadd.f32 %v958_v26, %v3012_v47  ;;  %v960_v34 = vpop.f32.mrb[19].mxu0  ;;  %v1227_v35 = vrot.slane %v3116_v22, 1  ;;  %v3141_v36 = vsel %vm1158_vm1, %v3116_v22, 0.0 }
 0x1e7   :  { %v1207_v40 = vsel %vm1186_vm5, %v3116_v22, 0.0  ;;  %v1280_v45 = vrot.slane %v3141_v36, 7  ;;  %v1322_v46 = vrot.slane %v3141_v36, 6  ;;  %v1383_v47 = vunpack.c.l.bf16 %v2999_v24  ;;  %v1378_v24 = vld [vmem:[%s3604_s6 + $0x6c] sm:$0xff] }
 0x1e8   :  { %v3150_v48 = vmax.f32 %v1004_v30, 0.0  ;;  %v991_v49 = vmul.f32 %v3063_v2, %v959_v31  ;;  %v1254_v50 = vrot.slane %v1207_v40, 2  ;;  %v2314_v52 = vpack.c.bf16 %v3116_v22, %v2421_v10 }
 0x1e9   :  { %v963_v53 = vpop.f32.mrb[20].mxu0  ;;  %v1228_v54 = vsel %vm1225_vm9, %v1226_v9, %v1227_v35  ;;  %v1281_v56 = vsel %vm1214_vm15, %v1279_v13, %v1280_v45  ;;  %v1300_v57 = vrot.slane %v1207_v40, 1  ;;  %v1343_v58 = vrot.slane %v3116_v22, 7 }
 0x1ea   :  { %v1005_v59 = vadd.f32 %v3081_v5, %v991_v49  ;;  %v964_v42 = vadd.f32 %v963_v53, %v3014_v51  ;;  %v965_v44 = vpop.f32.mrb[21].mxu0  ;;  %v1229_v32 = vrot.slane %v3150_v48, 1  ;;  %v3164_v1 = vsel %vm1159_vm2, %v3150_v48, 0.0 }
 0x1eb   :  { %v1282_v61 = vrot.slane %v3164_v1, 7  ;;  %v1323_v62 = vrot.slane %v3164_v1, 6  ;;  %v3171_v63 = vsel %vm1187_vm3, %v3150_v48, 0.0  ;;  %v1255_v0 = vsel %vm1252_vm4, %v1253_v38, %v1254_v50 }
 0x1ec   :  { %v3174_v51 = vmax.f32 %v1005_v59, 0.0  ;;  %v992_v18 = vmul.f32 %v3063_v2, %v964_v42  ;;  %v1230_v3 = vsel %vm1225_vm9, %v1227_v35, %v1229_v32  ;;  %v1256_v4 = vrot.slane %v3171_v63, 2 }
 0x1ed   :  { %vm1162_vm5 = vcmp.ne.s32.totalorder %v3127_v27, 6  ;;  %v968_v10 = vpop.f32.mrb[22].mxu0  ;;  %v2312_v9 = vpack.c.bf16 %v1230_v3, %v1228_v54  ;;  %v1283_v12 = vsel %vm1214_vm15, %v1280_v45, %v1282_v61  ;;  %v1301_v13 = vrot.slane %v3171_v63, 1 }
 0x1ee   :  { %v2341_v6 = vpack.c.bf16 %v3150_v48, %v3116_v22  ;;  %v1006_v14 = vadd.f32 %v3081_v5, %v992_v18  ;;  %v969_v7 = vadd.f32 %v968_v10, %v3016_v55  ;;  %v970_v8 = vpop.f32.mrb[23].mxu0  ;;  %v2327_v16 = vpack.c.bf16 %v1283_v12, %v1281_v56  ;;  %v1367_v22 = vld [vmem:[%s3604_s6 + $0x20] ss:$36 sps:$4 sm:$0xff]  }
 0x1ef   :  { %v1257_v17 = vsel %vm1252_vm4, %v1254_v50, %v1256_v4  ;;  %2313 = vmatprep.subr.bf16.mxu0 %v2312_v9  ;;  %v1231_v19 = vrot.slane %v3174_v51, 1  ;;  %v3198_v37 = vsel %vm1160_vm6, %v3174_v51, 0.0  ;;  %v3203_v20 = vsel %vm1188_vm7, %v3174_v51, 0.0 }
 0x1f0   :  { %v2329_v60 = vpack.c.bf16 %v1257_v17, %v1255_v0  ;;  %vm1163_vm1 = vcmp.ne.s32.totalorder %v3131_v28, 6  ;;  %v3207_v55 = vmax.f32 %v1006_v14, 0.0  ;;  %v993_v21 = vmul.f32 %v3063_v2, %v969_v7  ;;  %2316 = vmatpush1.bf16.xpose.msk.msra.mxu0 %vm3183_vm13, %v2314_v52  ;;  %2328 = vmatprep.subr.bf16.mxu1 %v2327_v16  ;;  %vm3250_vm13 = vmpackc.low %vm1160_vm6, %vm1159_vm2 }
 0x1f1   :  { %v1258_v38 = vrot.slane %v3203_v20, 2  ;;  %v1284_v23 = vrot.slane %v3198_v37, 7  ;;  %v973_v26 = vpop.f32.mrb[24].mxu0  ;;  %v1232_v30 = vsel %vm1225_vm9, %v1229_v32, %v1231_v19  ;;  %v1325_v31 = vrot.slane %v3198_v37, 6  ;;  %vm2325_vm6 = vmpackc.low %vm1162_vm5, %vm1161_vm8  ;;  %v1368_v37 = vld [vmem:[%s3604_s6 + $0x24] sm:$0xff] }
 0x1f2   :  { %2330 = vmatpush1.bf16.xpose.msra.mxu1 %v2329_v60  ;;  %v3218_v34 = vpack.c.bf16 %v3174_v51, %v3150_v48  ;;  %v3223_v35 = vsel %vm1225_vm9, %v1300_v57, %v1301_v13  ;;  %v1007_v40 = vadd.f32 %v3081_v5, %v993_v21  ;;  %v974_v45 = vadd.f32 %v973_v26, %v3018_v41  ;;  %v975_v49 = vpop.f32.mrb[25].mxu0 }
 0x1f3   :  { %v1233_v50 = vrot.slane %v3207_v55, 1  ;;  %v3231_v52 = vsel %vm1161_vm8, %v3207_v55, 0.0  ;;  %v1285_v53 = vsel %vm1214_vm15, %v1282_v61, %v1284_v23  ;;  %v1210_v57 = vsel %vm1189_vm10, %v3207_v55, 0.0 }
 0x1f4   :  { %v1286_v54 = vrot.slane %v3231_v52, 7  ;;  %v1327_v56 = vrot.slane %v3231_v52, 6  ;;  %v3240_v41 = vmax.f32 %v1007_v40, 0.0  ;;  %v994_v59 = vmul.f32 %v3063_v2, %v974_v45 }
 0x1f5   :  { %v1234_v42 = vsel %vm1225_vm9, %v1231_v19, %v1233_v50  ;;  %v1259_v44 = vsel %vm1252_vm4, %v1256_v4, %v1258_v38  ;;  %v978_v32 = vpop.f32.mrb[26].mxu0  ;;  %v1260_v3 = vrot.slane %v1210_v57, 2  ;;  %v1303_v10 = vrot.slane %v3203_v20, 1 }
 0x1f6   :  { %v2317_v61 = vpack.c.bf16 %v1234_v42, %v1232_v30  ;;  %v1287_v18 = vsel %vm1214_vm15, %v1284_v23, %v1286_v54  ;;  %v1008_v9 = vadd.f32 %v3081_v5, %v994_v59  ;;  %v979_v4 = vadd.f32 %v978_v32, %v3020_v43  ;;  %v980_v14 = vpop.f32.mrb[27].mxu0 }
 0x1f7   :  { %v2331_v33 = vpack.c.bf16 %v1287_v18, %v1285_v53  ;;  %v1235_v12 = vrot.slane %v3240_v41, 1  ;;  %v1261_v7 = vsel %vm1252_vm4, %v1258_v38, %v1260_v3  ;;  %v3263_v8 = vsel %vm1162_vm5, %v3240_v41, 0.0 }
 0x1f8   :  { %2318 = vmatprep.subr.bf16.mxu0 %v2317_v61  ;;  %v1211_v16 = vsel %vm1190_vm11, %v3240_v41, 0.0  ;;  %v3270_v17 = vpack.c.bf16 %v3240_v41, %v3207_v55  ;;  %vm1321_vm2 = vcmask 1041408   ;;  %v3272_v43 = vmax.f32 %v1008_v9, 0.0 }
 0x1f9   :  { %v995_v60 = vmul.f32 %v3063_v2, %v979_v4  ;;  %2321 = vmatpush1.bf16.xpose.msk.msra.mxu0 %vm3250_vm13, %v3218_v34  ;;  %2332 = vmatprep.subr.bf16.mxu1 %v2331_v33  ;;  %v2333_v19 = vpack.c.bf16 %v1261_v7, %v1259_v44  ;;  %v1236_v20 = vsel %vm1225_vm9, %v1233_v50, %v1235_v12  ;;  %v1262_v21 = vrot.slane %v1211_v16, 2 }
 0x1fa   :  { %v1288_v38 = vrot.slane %v3263_v8, 7  ;;  %v1329_v23 = vrot.slane %v3263_v8, 6  ;;  %v3284_v26 = vsel %vm1225_vm9, %v1301_v13, %v1303_v10  ;;  %v1237_v30 = vrot.slane %v3272_v43, 1 }
 0x1fb   :  { %v1009_v2 = vadd.f32 %v3081_v5, %v995_v60  ;;  %2334 = vmatpush1.bf16.xpose.msra.mxu1 %v2333_v19  ;;  %v3291_v40 = vsel %vm1163_vm1, %v3272_v43, 0.0  ;;  %v3296_v45 = vsel %vm1191_vm14, %v3272_v43, 0.0  ;;  %v1263_v5 = vsel %vm1252_vm4, %v1260_v3, %v1262_v21 }
 0x1fc   :  { %v1289_v63 = vsel %vm1214_vm15, %v1286_v54, %v1288_v38  ;;  %v1290_v13 = vrot.slane %v3291_v40, 7  ;;  %v1331_v49 = vrot.slane %v3291_v40, 6  ;;  %v1238_v53 = vsel %vm1225_vm9, %v1235_v12, %v1237_v30 }
 0x1fd   :  { %v3302_v50 = vmax.f32 %v1009_v2, 0.0  ;;  %v1264_v59 = vrot.slane %v3296_v45, 2  ;;  %v2339_v42 = vpack.c.bf16 %v3284_v26, %v3223_v35  ;;  %v2322_v44 = vpack.c.bf16 %v1238_v53, %v1236_v20 }
 0x1fe   :  { %v1291_v54 = vsel %vm1214_vm15, %v1288_v38, %v1290_v13  ;;  %v1305_v32 = vrot.slane %v1210_v57, 1  ;;  %v1307_v61 = vrot.slane %v1211_v16, 1  ;;  %v2345_v3 = vpack.c.bf16 %v3207_v55, %v3174_v51 }
 0x1ff   :  { %v2335_v0 = vpack.c.bf16 %v1291_v54, %v1289_v63  ;;  %v1265_v18 = vsel %vm1252_vm4, %v1262_v21, %v1264_v59  ;;  %v1185_v9 = vsel %vm1164_vm0, %v3302_v50, 0.0  ;;  %2323 = vmatprep.subr.bf16.mxu0 %v2322_v44  ;;  %v1213_v12 = vsel %vm1192_vm12, %v3302_v50, 0.0  ;;  %vm3509_vm4 = vmpackc.low %vm1214_vm15, %vm1191_vm14 }
 0x200   :  { %v2337_v4 = vpack.c.bf16 %v1265_v18, %v1263_v5  ;;  %v3322_v33 = vsel %vm1225_vm9, %v1303_v10, %v1305_v32  ;;  %v3325_v57 = vsel %vm1225_vm9, %v1305_v32, %v1307_v61  ;;  %v3334_v7 = vsel %vm1214_vm15, %v1213_v12, 0.0 }
 0x201   :  { %2326 = vmatpush1.bf16.xpose.msk.msra.mxu0 %vm2325_vm6, %v3270_v17  ;;  %2336 = vmatprep.subr.bf16.mxu1 %v2335_v0  ;;  %v2343_v14 = vpack.c.bf16 %v3325_v57, %v3322_v33  ;;  %v3337_v16 = vpack.c.bf16 %v1213_v12, %v3272_v43  ;;  %v1309_v10 = vrot.slane %v3296_v45, 1  ;;  %v1311_v60 = vrot.slane %v3334_v7, 1 }
 0x202   :  { %1431 = vmatprep.subr.mxu0 %v1237_v30  ;;  %v2349_v29 = vpack.c.bf16 %v3272_v43, %v3240_v41  ;;  %v1344_v19 = vrot.slane %v3150_v48, 7  ;;  %v1346_v20 = vrot.slane %v3174_v51, 7  ;;  %v3353_v38 = vsel %vm1321_vm2, %v1322_v46, %v1323_v62 }
 0x203   :  { %2338 = vmatpush1.bf16.xpose.msra.mxu1 %v2337_v4  ;;  %v3346_v21 = vsel %vm1225_vm9, %v1307_v61, %v1309_v10  ;;  %v3360_v2 = vsel %vm1321_vm2, %v1323_v62, %v1325_v31  ;;  %v1348_v30 = vrot.slane %v3207_v55, 7  ;;  %v3366_v63 = vsel %vm1225_vm9, %v1309_v10, %v1311_v60  ;;  %vm3412_vm9 = vmpackc.low %vm1188_vm7, %vm1187_vm3 }
 0x204   :  { %1516 = vmatprep.subr.mxu1 %v1290_v13  ;;  %v3371_v36 = vsel %vm1214_vm15, %v1343_v58, %v1344_v19  ;;  %v3374_v46 = vsel %vm1214_vm15, %v1344_v19, %v1346_v20  ;;  %v2353_v1 = vpack.c.bf16 %v3360_v2, %v3353_v38  ;;  %v2347_v62 = vpack.c.bf16 %v3366_v63, %v3346_v21  ;;  %vm3471_vm3 = vmpackc.low %vm1190_vm11, %vm1189_vm10 }
 0x205   :  { %v2351_v13 = vpack.c.bf16 %v3374_v46, %v3371_v36  ;;  %v3383_v5 = vsel %vm1214_vm15, %v1346_v20, %v1348_v30  ;;  %v1350_v53 = vrot.slane %v3240_v41, 7  ;;  %v3391_v58 = vsel %vm1321_vm2, %v1325_v31, %v1327_v56  ;;  %v1373_v20 = vld [vmem:[%s3604_s6 + $0x48] sm:$0xff]  ;;  %v1375_v41 = vld [vmem:[%s3604_s6 + $0x58] sm:$0xff] }
 0x206   :  { %v3398_v44 = vsel %vm1321_vm2, %v1327_v56, %v1329_v23  ;;  %v3402_v54 = vsel %vm1214_vm15, %v3302_v50, 0.0  ;;  %v1352_v32 = vrot.slane %v3272_v43, 7  ;;  %v3423_v0 = vsel %vm1214_vm15, %v1185_v9, 0.0  ;;  %v1366_v36 = vld [vmem:[%s3604_s6 + $0x18] sm:$0xff] }
 0x207   :  { %v3417_v52 = vsel %vm1214_vm15, %v1348_v30, %v1350_v53  ;;  %v2357_v56 = vpack.c.bf16 %v3398_v44, %v3391_v58  ;;  %v1354_v61 = vrot.slane %v3402_v54, 7  ;;  %v3438_v4 = vsel %vm1321_vm2, %v1329_v23, %v1331_v49  ;;  %v1371_v46 = vld [vmem:[%s3604_s6 + $0x3c] sm:$0xff]  ;;  %v1381_v58 = vld [vmem:[%s3604_s6 + $0x84] sm:$0xff] }
 0x208   :  { %v2355_v15 = vpack.c.bf16 %v3417_v52, %v3383_v5  ;;  %v3431_v18 = vsel %vm1214_vm15, %v1350_v53, %v1352_v32  ;;  %v1333_v9 = vrot.slane %v3423_v0, 6  ;;  %v1393_v10 = vunpack.c.h.bf16 %v1368_v37 }
 0x209   :  { %1867 = vmatpush1.xpose.msk.msra.mxu0 %vm1163_vm1, %v3272_v43  ;;  %v3447_v12 = vsel %vm1214_vm15, %v1352_v32, %v1354_v61  ;;  %v1385_v8 = vunpack.c.l.bf16 %v3004_v25  ;;  %v1395_v30 = vunpack.c.h.bf16 %v1369_v11  ;;  %v1392_v27 = vunpack.c.l.bf16 %v1368_v37 }
 0x20a   :  { %2365 = vmatprep.subr.msk.bf16.mxu0 %vm3412_vm9, %v3218_v34  ;;  %v2359_v23 = vpack.c.bf16 %v3447_v12, %v3431_v18  ;;  %v3460_v19 = vsel %vm1321_vm2, %v1331_v49, %v1333_v9  ;;  %v1402_v45 = vunpack.c.h.bf16 %v1373_v20  ;;  %v1394_v35 = vunpack.c.l.bf16 %v1369_v11 }
 0x20b   :  { %1517 = vmatpush1.xpose.msra.mxu1 %v1264_v59  ;;  %v2361_v40 = vpack.c.bf16 %v3460_v19, %v3438_v4  ;;  %v1401_v26 = vunpack.c.l.bf16 %v1373_v20  ;;  %v1411_v49 = vunpack.c.h.bf16 %v1378_v24  ;;  %v1403_v59 = vunpack.c.l.bf16 %v1374_v39 }
 0x20c   :  { %2340 = vmatprep.subr.bf16.mxu1 %v2339_v42  ;;  %1484 = vmatmul.mubr.f32.vlgmr.msra.gmra.mrb[28].mxu0 %v1383_v47  ;;  %v1404_v47 = vunpack.c.h.bf16 %v1374_v39  ;;  %v1365_v42 = vld [vmem:[%s3604_s6 + $0x10] sm:$0xff]  ;;  %v1410_v33 = vunpack.c.l.bf16 %v1378_v24  ;;  %v1391_v57 = vunpack.c.l.bf16 %v1367_v22  ;;  %v1400_v51 = vunpack.c.h.bf16 %v1367_v22 }
 0x20d   :  { %2368 = vmatpush3.bf16.xpose.msk.msra.mxu0 %vm3412_vm9, %v3218_v34  ;;  %1488 = vmatprep.mubr.f32.mxu0 %v1393_v10  ;;  %v1379_v34 = vld [vmem:[%s3604_s6 + $0x74] sm:$0xff]  ;;  %v1406_v7 = vunpack.c.h.bf16 %v1375_v41  ;;  %v1390_v2 = vunpack.c.h.bf16 %v1366_v36  ;;  %v1398_v5 = vunpack.c.l.bf16 %v1371_v46  ;;  %v1417_v54 = vunpack.c.h.bf16 %v1381_v58 }
 0x20e   :  { %1569 = vmatmul.mubr.f32.vlgmr.msra.gmra.mrb[14].mxu1 %v1385_v8  ;;  %2371 = vmatprep.subr.msk.bf16.mxu0 %vm3471_vm3, %v3270_v17  ;;  %v1412_v28 = vunpack.c.l.bf16 %v1379_v34  ;;  %v1416_v32 = vunpack.c.l.bf16 %v1381_v58 }
 0x20f   :  { %2342 = vmatpush1.bf16.xpose.msra.mxu1 %v2341_v6  ;;  %1573 = vmatprep.mubr.f32.mxu1 %v1395_v30  ;;  %v1413_v6 = vunpack.c.h.bf16 %v1379_v34 }
 0x210   :  { %2344 = vmatprep.subr.bf16.mxu1 %v2343_v14  ;;  %1489 = vmatmul.mubr.f32.gmra.mrb[30].mxu0 %v1392_v27  ;;  %v1388_v14 = vunpack.c.h.bf16 %v1365_v42 }
 0x211   :  { %1493 = vmatprep.mubr.f32.mxu0 %v1402_v45 }
 0x212   :  { %1574 = vmatmul.mubr.f32.gmra.mrb[16].mxu1 %v1394_v35 }
 0x213   :  { %1578 = vmatprep.mubr.f32.mxu1 %v1404_v47 }
 0x214   :  { %1494 = vmatmul.mubr.f32.gmra.mrb[32].mxu0 %v1401_v26 }
 0x215   :  { %2374 = vmatpush3.bf16.xpose.msk.msra.mxu0 %vm3471_vm3, %v3270_v17  ;;  %1498 = vmatprep.mubr.f32.mxu0 %v1411_v49  ;;  %v1377_v17 = vld [vmem:[%s3604_s6 + $0x68] ss:$36 sps:$4 sm:$0xff]  }
 0x216   :  { %2377 = vmatprep.subr.msk.bf16.mxu0 %vm3509_vm4, %v3337_v16  ;;  %1579 = vmatmul.mubr.f32.gmra.mrb[18].mxu1 %v1403_v59  ;;  %v1409_v55 = vunpack.c.l.bf16 %v1377_v17  ;;  %v1418_v21 = vunpack.c.h.bf16 %v1377_v17 }
 0x217   :  { %2346 = vmatpush1.bf16.xpose.msra.mxu1 %v2345_v3  ;;  %1583 = vmatprep.mubr.f32.mxu1 %v1413_v6  ;;  %v1370_v3 = vld [vmem:[%s3604_s6 + $0x34] sm:$0xff] }
 0x218   :  { %2348 = vmatprep.subr.bf16.mxu1 %v2347_v62  ;;  %1499 = vmatmul.mubr.f32.gmra.mrb[34].mxu0 %v1410_v33  ;;  %v1397_v63 = vunpack.c.h.bf16 %v1370_v3  ;;  %v1396_v43 = vunpack.c.l.bf16 %v1370_v3  ;;  %v1399_v62 = vunpack.c.h.bf16 %v1371_v46 }
 0x219   :  { %2212 = vmatprep.mubr.f32.mxu0 %v1391_v57 }
 0x21a   :  { %1584 = vmatmul.mubr.f32.gmra.mrb[20].mxu1 %v1412_v28 }
 0x21b   :  { %1653 = vmatprep.mubr.f32.mxu1 %v1388_v14 }
 0x21d   :  { %2380 = vmatpush3.bf16.xpose.msk.msra.mxu0 %vm3509_vm4, %v3337_v16  ;;  %v1387_v16 = vunpack.c.l.bf16 %v1365_v42 }
 0x21f   :  { %2350 = vmatpush1.bf16.xpose.msra.mxu1 %v2349_v29 }
 0x220   :  { %1601 = vmatprep.subr.mxu1 %v1311_v60  ;;  %v1405_v60 = vunpack.c.l.bf16 %v1375_v41 }
 0x224   :  { %2213 = vmatmul.mubr.f32.vlgmr.msra.gmra.mrb[36].mxu0 %v1400_v51 }
 0x225   :  { %2215 = vmatprep.mubr.f32.mxu0 %v1409_v55 }
 0x227   :  { %1868 = vmatpush1.xpose.msk.msra.mxu1 %vm1214_vm15, %v3302_v50  ;;  %v1380_v50 = vld [vmem:[%s3604_s6 + $0x7c] sm:$0xff]  ;;  %vm1844_vm15 = vcmask 400384  }
 0x228   :  { %2352 = vmatprep.subr.bf16.mxu1 %v2351_v13  ;;  %2216 = vmatmul.mubr.f32.gmra.mrb[38].mxu0 %v1418_v21  ;;  %v1415_v29 = vunpack.c.h.bf16 %v1380_v50  ;;  %v1414_v38 = vunpack.c.l.bf16 %v1380_v50  ;;  %v1376_v13 = vld [vmem:[%s3604_s6 + $0x60] sm:$0xff] }
 0x229   :  { %v1408_v53 = vunpack.c.h.bf16 %v1376_v13  ;;  %v1407_v44 = vunpack.c.l.bf16 %v1376_v13 }
 0x22a   :  { %1654 = vmatmul.mubr.f32.vlgmr.msra.gmra.mrb[14].mxu1 %v1387_v16 }
 0x22b   :  { %2354 = vmatpush1.bf16.xpose.msra.mxu1 %v2353_v1  ;;  %1658 = vmatprep.mubr.f32.mxu1 %v1397_v63  ;;  %v1389_v1 = vunpack.c.l.bf16 %v1366_v36 }
 0x22c   :  { %2356 = vmatprep.subr.bf16.mxu1 %v2355_v15 }
 0x22e   :  { %1659 = vmatmul.mubr.f32.gmra.mrb[16].mxu1 %v1396_v43 }
 0x22f   :  { %1663 = vmatprep.mubr.f32.mxu1 %v1406_v7 }
 0x232   :  { %1664 = vmatmul.mubr.f32.gmra.mrb[18].mxu1 %v1405_v60 }
 0x233   :  { %2358 = vmatpush1.bf16.xpose.msra.mxu1 %v2357_v56  ;;  %1668 = vmatprep.mubr.f32.mxu1 %v1415_v29 }
 0x234   :  { %2360 = vmatprep.subr.bf16.mxu1 %v2359_v23 }
 0x236   :  { %1669 = vmatmul.mubr.f32.gmra.mrb[20].mxu1 %v1414_v38 }
 0x237   :  { %1738 = vmatprep.mubr.f32.mxu1 %v1390_v2 }
 0x23b   :  { %2362 = vmatpush1.bf16.xpose.msra.mxu1 %v2361_v40 }
 0x23c   :  { %1686 = vmatprep.subr.mxu1 %v1354_v61 }
 0x243   :  { %1687 = vmatpush1.xpose.msra.mxu1 %v1333_v9 }
 0x246   :  { %1739 = vmatmul.mubr.f32.vlgmr.msra.gmra.mrb[14].mxu1 %v1389_v1 }
 0x247   :  { %1743 = vmatprep.mubr.f32.mxu1 %v1399_v62 }
 0x24a   :  { %1744 = vmatmul.mubr.f32.gmra.mrb[16].mxu1 %v1398_v5 }
 0x24b   :  { %1748 = vmatprep.mubr.f32.mxu1 %v1408_v53 }
 0x24e   :  { %1749 = vmatmul.mubr.f32.gmra.mrb[18].mxu1 %v1407_v44 }
 0x24f   :  { %1753 = vmatprep.mubr.f32.mxu1 %v1417_v54 }
 0x252   :  { %1754 = vmatmul.mubr.f32.gmra.mrb[20].mxu1 %v1416_v32 }
 0x2df   :  { %v1485_v37 = vpop.f32.mrb[28].mxu0 }
 0x2e0   :  { %v1487_v31 = vpop.f32.mrb[29].mxu0 }
 0x2e3   :  { %v1490_v52 = vpop.f32.mrb[30].mxu0 }
 0x2e4   :  { %v1492_v56 = vpop.f32.mrb[31].mxu0 }
 0x2e7   :  { %v1495_v61 = vpop.f32.mrb[32].mxu0 }
 0x2e8   :  { %v1497_v0 = vpop.f32.mrb[33].mxu0 }
 0x2eb   :  { %v1500_v11 = vpop.f32.mrb[34].mxu0 }
 0x2ec   :  { %v1502_v15 = vpop.f32.mrb[35].mxu0 }
 0x2f7   :  { %v2214_v18 = vpop.f32.mrb[36].mxu0 }
 0x2f8   :  { %v1825_v4 = vpop.f32.mrb[37].mxu0 }
 0x2fb   :  { %v2217_v9 = vpop.f32.mrb[38].mxu0 }
 0x2fc   :  { %v1835_v12 = vpop.f32.mrb[39].mxu0 }
 0x319   :  { %v1740_v10 = vpop.f32.mrb[14].mxu1 }
 0x31a   :  { %v2381_v8 = vadd.f32 %v1740_v10, %v1485_v37  ;;  %v1742_v23 = vpop.f32.mrb[15].mxu1 }
 0x31c   :  { %v1826_v19 = vadd.f32 %v2381_v8, %v1825_v4 }
 0x31d   :  { %v1745_v20 = vpop.f32.mrb[16].mxu1 }
 0x31e   :  { %1845 = vst.msk [vmem:[%s3607_s7] sm:$0xff] %vm1844_vm15, %v1826_v19  ;;  %v2382_v25 = vadd.f32 %v1745_v20, %v1490_v52  ;;  %v1747_v30 = vpop.f32.mrb[17].mxu1 }
 0x320   :  { %v1831_v40 = vadd.f32 %v2382_v25, %v2214_v18 }
 0x321   :  { %v1750_v39 = vpop.f32.mrb[18].mxu1 }
 0x322   :  { %1846 = vst.msk [vmem:[%s3607_s7 + $0x8] sm:$0xff] %vm1844_vm15, %v1831_v40  ;;  %v2383_v27 = vadd.f32 %v1750_v39, %v1495_v61  ;;  %v1752_v45 = vpop.f32.mrb[19].mxu1 }
 0x324   :  { %v1836_v35 = vadd.f32 %v2383_v27, %v1835_v12 }
 0x325   :  { %v1755_v24 = vpop.f32.mrb[20].mxu1 }
 0x326   :  { %1847 = vst.msk [vmem:[%s3607_s7 + $0x10] sm:$0xff] %vm1844_vm15, %v1836_v35  ;;  %v2384_v47 = vadd.f32 %v1755_v24, %v1500_v11  ;;  %v1757_v34 = vpop.f32.mrb[21].mxu1 }
 0x328   :  { %v1841_v26 = vadd.f32 %v2384_v47, %v2217_v9 }
 0x32a   :  { %1848 = vst.msk [vmem:[%s3607_s7 + $0x18] sm:$0xff] %vm1844_vm15, %v1841_v26 }

</bundles_post_ra>
